<compile_context>
chip_gen: v5e
topology: v5e:2x2
jax: 0.10.0
libtpu: 0.0.40
codegen_flags: <defaults>
</compile_context>

<pallas_src>
import jax
import jax.numpy as jnp
import numpy as np
from jax.experimental import pallas as pl
from jax.experimental.pallas import tpu as pltpu

BN_EPS = 1e-5
_OFF = 16   # leading pad rows of the staged conv1 buffer: keeps the (+1/-1)-shifted
            # group stores in bounds and keeps the dy*Sp load offsets 16-aligned.


def _round_up(x, m):
    return ((x + m - 1) // m) * m


# ---------------------------------------------------------------------------
# Kernel
# ---------------------------------------------------------------------------
def _make_kernel(TH, Sp, Cin, P, Cout):
    L = TH * Sp                 # flat output rows per tile (padded-width layout)

    def kernel(xb_ref, xt_ref, xbo_ref, w1_ref, w2_ref, w3_ref,
               b1m_ref, b2_ref, b3_ref, o_ref, h1w_ref):
        r = pl.program_id(1)
        w1 = w1_ref[...]
        b1m = b1m_ref[...]                       # (Sp, P) column-masked BN1 bias

        def conv1(x2d):
            # (rows, Cin) bf16 -> (rows, P) f32 ; masked bias keeps the padding ring 0.
            a = jnp.dot(x2d, w1, preferred_element_type=jnp.float32)
            rows = x2d.shape[0]
            a = a.reshape(rows // Sp, Sp, P) + b1m[None]
            return jnp.maximum(a, 0.0).reshape(rows, P)

        def stash(piece_bf16, g0):
            # Window elements [g0, g0+n) -> lane group k (== dx) of the staged buffer,
            # shifted by (1 - k) rows:  h1w[_OFF + t, kP:(k+1)P] = h1_window[t + k - 1].
            n = piece_bf16.shape[0]
            for k in range(3):
                h1w_ref[pl.ds(_OFF + g0 + 1 - k, n), k * P:(k + 1) * P] = piece_bf16

        # ---- conv1 (1x1) + BN1 + ReLU, staged for the 3x3 stage --------------
        body = xb_ref[0].reshape(L, Cin)                          # bf16
        stash(conv1(body).astype(jnp.bfloat16), Sp)

        top_scale = (r > 0).astype(jnp.float32)                       # zero row above image
        bot_scale = (r < pl.num_programs(1) - 1).astype(jnp.float32)  # zero row below image
        stash((conv1(xt_ref[0, 0]) * top_scale).astype(jnp.bfloat16), 0)
        stash((conv1(xbo_ref[0, 0]) * bot_scale).astype(jnp.bfloat16), (TH + 1) * Sp)

        # ---- conv2 (3x3, pad=1) + BN2 + ReLU: 3 matmuls with K = 3P ----------
        acc = jnp.zeros((L, P), jnp.float32)
        for dy in range(3):
            acc = acc + jnp.dot(h1w_ref[pl.ds(_OFF + dy * Sp, L), :], w2_ref[dy],
                                preferred_element_type=jnp.float32)
        h2 = jnp.maximum(acc + b2_ref[...], 0.0).astype(jnp.bfloat16)

        # ---- conv3 (1x1) + BN3 + identity residual + ReLU --------------------
        h3 = jnp.dot(h2, w3_ref[...], preferred_element_type=jnp.float32)
        out = jnp.maximum(h3 + b3_ref[...] + body.astype(jnp.float32), 0.0)
        o_ref[0] = out.reshape(TH, Sp, Cout).astype(o_ref.dtype)

    return kernel


# ---------------------------------------------------------------------------
# Sizing helpers
# ---------------------------------------------------------------------------
def _vmem_estimate(TH, Sp, Cin, P, Cout):
    L = TH * Sp
    NW = (TH + 2) * Sp
    est = 0
    est += 2 * TH * Sp * Cin * 2                              # body block (double-buffered)
    est += 2 * 2 * Sp * Cin * 2                               # halo rows
    est += 2 * TH * Sp * Cout * 2                             # output block
    est += 2 * ((Cin * P + 9 * P * P + P * Cout) * 2
                + (Sp * P + P + Cout) * 4)                    # weights / biases
    est += (_OFF + NW + 16) * 3 * P * 2                       # staged conv1 buffer
    est += L * (2 * P + Cin + Cout) * 4 + L * 3 * P * 2       # f32 / bf16 temporaries
    return est


def _vmem_limit(TH, Sp, Cin, P, Cout):
    est = _vmem_estimate(TH, Sp, Cin, P, Cout)
    # cap at 56 MiB so the same setting is safe on v7x (64 MiB/TC) as well as v5e/v6e.
    return int(min(56 * 2 ** 20, max(32 * 2 ** 20, int(1.5 * est) + 8 * 2 ** 20)))


def _pick_row_block(H, W, N, Cin, P, Cout):
    Sp = _round_up(W + 2, 16)
    best = 1
    for t in range(1, H + 1):
        if H % t == 0 and t * Sp <= 8192 and _vmem_estimate(t, Sp, Cin, P, Cout) <= 24 * 2 ** 20:
            best = t
    th = best
    # keep the total step count even so both v7x TensorCores get work
    if (N * (H // th)) % 2 == 1:
        for t in range(th - 1, 0, -1):
            if H % t == 0 and (N * (H // t)) % 2 == 0:
                th = t
                break
    return th


# ---------------------------------------------------------------------------
# Wrapper
# ---------------------------------------------------------------------------
def bottleneck_forward(x_nchw, params, row_block=None):
    w1, w2m, w3 = params["w1"], params["w2m"], params["w3"]     # bf16, BN scales folded
    b1, b2, b3 = params["b1"], params["b2"], params["b3"]       # f32 folded BN biases

    N, Cin, H, W = x_nchw.shape
    P = w1.shape[1]
    Cout = w3.shape[1]
    assert Cin == Cout, "identity residual requires inplanes == planes * 4"

    Sp = _round_up(W + 2, 16)            # padded row stride, sublane-aligned
    TH = row_block if row_block is not None else _pick_row_block(H, W, N, Cin, P, Cout)
    assert H % TH == 0
    R = H // TH

    # NHWC bf16, zero column padding only.  Rows (incl. the 1-row halo) are fetched
    # straight from this array by three BlockSpec views — no overlapping-tile copy.
    x_nhwc = jnp.transpose(x_nchw, (0, 2, 3, 1)).astype(jnp.bfloat16)
    xr = jnp.pad(x_nhwc, ((0, 0), (0, 0), (1, Sp - W - 1), (0, 0)))     # (N, H, Sp, Cin)

    # Column-masked BN1 bias: zero on the padding ring so h1 padding stays exactly 0.
    b1m = jnp.zeros((Sp, P), jnp.float32).at[1:W + 1, :].set(b1[0])

    kernel = _make_kernel(TH, Sp, Cin, P, Cout)

    flops = 2 * N * H * W * (Cin * P + 9 * P * P + P * Cout)
    bytes_accessed = int(N * (H + 2 * R) * Sp * Cin * 2 + N * H * Sp * Cout * 2
                         + (w1.size + w2m.size + w3.size) * 2
                         + (b1m.size + b2.size + b3.size) * 4)

    body_spec = pl.BlockSpec((1, TH, Sp, Cin), lambda n, r: (n, r, 0, 0))
    top_spec = pl.BlockSpec((1, 1, Sp, Cin),
                            lambda n, r: (n, jnp.maximum(r * TH - 1, 0), 0, 0))
    bot_spec = pl.BlockSpec((1, 1, Sp, Cin),
                            lambda n, r: (n, jnp.minimum(r * TH + TH, H - 1), 0, 0))

    out_padded = pl.pallas_call(
        kernel,
        out_shape=jax.ShapeDtypeStruct((N, H, Sp, Cout), jnp.bfloat16),
        grid=(N, R),
        in_specs=[
            body_spec, top_spec, bot_spec,
            pl.BlockSpec((Cin, P), lambda n, r: (0, 0)),
            pl.BlockSpec((3, 3 * P, P), lambda n, r: (0, 0, 0)),
            pl.BlockSpec((P, Cout), lambda n, r: (0, 0)),
            pl.BlockSpec((Sp, P), lambda n, r: (0, 0)),
            pl.BlockSpec((1, P), lambda n, r: (0, 0)),
            pl.BlockSpec((1, Cout), lambda n, r: (0, 0)),
        ],
        out_specs=pl.BlockSpec((1, TH, Sp, Cout), lambda n, r: (n, r, 0, 0)),
        scratch_shapes=[pltpu.VMEM((_OFF + (TH + 2) * Sp + 16, 3 * P), jnp.bfloat16)],
        compiler_params=pltpu.CompilerParams(
            dimension_semantics=("parallel", "parallel"),
            vmem_limit_bytes=_vmem_limit(TH, Sp, Cin, P, Cout)),
        cost_estimate=pl.CostEstimate(flops=flops, transcendentals=0,
                                      bytes_accessed=bytes_accessed),
    )(xr, xr, xr, w1, w2m, w3, b1m, b2, b3)

    out = out_padded[:, :, 1:W + 1, :]                  # drop pad columns (wrapper side)
    return jnp.transpose(out, (0, 3, 1, 2)).astype(jnp.float32)


# ---------------------------------------------------------------------------
# Parameter construction (deterministic, synthetic) + pure-JAX reference
# ---------------------------------------------------------------------------
def _fold_bn(gamma, beta, mean, var, eps=BN_EPS):
    scale = gamma / jnp.sqrt(var + eps)
    return scale, beta - mean * scale


def make_params(key, inplanes, planes):
    exp = 4
    cout = planes * exp
    ks = jax.random.split(key, 6)
    w1_t = 0.2 * jax.random.normal(ks[0], (planes, inplanes, 1, 1), jnp.float32)
    w2_t = 0.2 * jax.random.normal(ks[1], (planes, planes, 3, 3), jnp.float32)
    w3_t = 0.2 * jax.random.normal(ks[2], (cout, planes, 1, 1), jnp.float32)

    def bn(k, c):
        k1, k2, k3, k4 = jax.random.split(k, 4)
        gamma = jax.random.uniform(k1, (c,), jnp.float32, 0.5, 1.5)
        beta = 0.1 * jax.random.normal(k2, (c,), jnp.float32)
        mean = 0.1 * jax.random.normal(k3, (c,), jnp.float32)
        var = jax.random.uniform(k4, (c,), jnp.float32, 0.5, 1.5)
        return _fold_bn(gamma, beta, mean, var)

    s1, b1 = bn(ks[3], planes)
    s2, b2 = bn(ks[4], planes)
    s3, b3 = bn(ks[5], cout)

    # channel-last matmul weights with the BN scale folded into output columns
    w1 = (jnp.transpose(w1_t[:, :, 0, 0], (1, 0)) * s1[None, :]).astype(jnp.bfloat16)
    w2 = (jnp.transpose(w2_t, (2, 3, 1, 0)) * s2[None, None, None, :]).astype(jnp.bfloat16)
    w2_taps = w2.reshape(9, planes, planes)            # (ky*3+kx, cin, cout)  (reference)
    w2m = w2.reshape(3, 3 * planes, planes)            # (ky, kx*P+cin, cout)  (kernel)
    w3 = (jnp.transpose(w3_t[:, :, 0, 0], (1, 0)) * s3[None, :]).astype(jnp.bfloat16)

    return {
        "w1": w1, "w2_taps": w2_taps, "w2m": w2m, "w3": w3,
        "b1": b1.reshape(1, -1).astype(jnp.float32),
        "b2": b2.reshape(1, -1).astype(jnp.float32),
        "b3": b3.reshape(1, -1).astype(jnp.float32),
    }


def bottleneck_reference(x_nchw, p):
    """Pure-JAX reference at matching (bf16 matmul, f32 accumulate, bf16 output) precision."""
    f32 = jnp.float32
    x = jnp.transpose(x_nchw, (0, 2, 3, 1)).astype(jnp.bfloat16)
    N, H, W, _ = x.shape
    P = p["w1"].shape[1]

    h1 = jnp.einsum("nhwc,cp->nhwp", x, p["w1"], preferred_element_type=f32)
    h1 = jnp.maximum(h1 + p["b1"][0], 0.0).astype(jnp.bfloat16)
    hp = jnp.pad(h1, ((0, 0), (1, 1), (1, 1), (0, 0)))
    acc = jnp.zeros((N, H, W, P), f32)
    for dy in range(3):
        for dx in range(3):
            acc = acc + jnp.einsum("nhwc,cp->nhwp",
                                   hp[:, dy:dy + H, dx:dx + W, :],
                                   p["w2_taps"][dy * 3 + dx],
                                   preferred_element_type=f32)
    h2 = jnp.maximum(acc + p["b2"][0], 0.0).astype(jnp.bfloat16)
    h3 = jnp.einsum("nhwc,cp->nhwp", h2, p["w3"], preferred_element_type=f32)
    out = jnp.maximum(h3 + p["b3"][0] + x.astype(f32), 0.0)
    return jnp.transpose(out, (0, 3, 1, 2)).astype(jnp.bfloat16).astype(f32)


# ---------------------------------------------------------------------------
if __name__ == "__main__":
    key = jax.random.PRNGKey(0)
    k_x, k_p = jax.random.split(key)

    N, H, W = 2, 16, 16
    planes = 4
    inplanes = planes * 4       # identity residual requires inplanes == planes * 4

    x = jax.random.normal(k_x, (N, inplanes, H, W), jnp.float32)
    params = make_params(k_p, inplanes, planes)

    # row_block=8 -> grid (2, 2): exercises real inter-tile halos on both sides.
    out = jax.block_until_ready(bottleneck_forward(x, params, row_block=8))
    ref = jax.block_until_ready(bottleneck_reference(x, params))

    assert out.shape == (N, planes * 4, H, W)
    o_np, r_np = np.asarray(out), np.asarray(ref)
    if not np.allclose(o_np, r_np, atol=3e-2, rtol=3e-2):
        raise AssertionError(f"mismatch: max abs diff = {np.max(np.abs(o_np - r_np))}")

    print("KERNEL_OK")
</pallas_src>

<mosaic_0001>
module attributes {stable_mosaic.version = 11 : i64} {
  func.func @kernel(%arg0: i32, %arg1: i32, %arg2: memref<1x8x32x16xbf16, #tpu.memory_space<vmem>>, %arg3: memref<1x1x32x16xbf16, #tpu.memory_space<vmem>>, %arg4: memref<1x1x32x16xbf16, #tpu.memory_space<vmem>>, %arg5: memref<16x4xbf16, #tpu.memory_space<vmem>>, %arg6: memref<3x12x4xbf16, #tpu.memory_space<vmem>>, %arg7: memref<4x16xbf16, #tpu.memory_space<vmem>>, %arg8: memref<32x4xf32, #tpu.memory_space<vmem>>, %arg9: memref<1x4xf32, #tpu.memory_space<vmem>>, %arg10: memref<1x16xf32, #tpu.memory_space<vmem>>, %arg11: memref<1x8x32x16xbf16, #tpu.memory_space<vmem>>, %arg12: memref<352x12xbf16, #tpu.memory_space<vmem>>) attributes {dimension_semantics = [#tpu.dimension_semantics<parallel>, #tpu.dimension_semantics<parallel>], iteration_bounds = array<i64: 2, 2>, scalar_prefetch = 0 : i64, scratch_operands = 1 : i64, tpu.core_type = #tpu.core_type<tc>, window_params = [{transform_indices = @transform_0, window_bounds = array<i64: 1, 8, 32, 16>}, {transform_indices = @transform_1, window_bounds = array<i64: 1, 1, 32, 16>}, {transform_indices = @transform_2, window_bounds = array<i64: 1, 1, 32, 16>}, {pipeline_mode = #tpu.pipeline_mode<synchronous>, transform_indices = @transform_3, window_bounds = array<i64: 16, 4>}, {pipeline_mode = #tpu.pipeline_mode<synchronous>, transform_indices = @transform_4, window_bounds = array<i64: 3, 12, 4>}, {pipeline_mode = #tpu.pipeline_mode<synchronous>, transform_indices = @transform_5, window_bounds = array<i64: 4, 16>}, {pipeline_mode = #tpu.pipeline_mode<synchronous>, transform_indices = @transform_6, window_bounds = array<i64: 32, 4>}, {pipeline_mode = #tpu.pipeline_mode<synchronous>, transform_indices = @transform_7, window_bounds = array<i64: 1, 4>}, {pipeline_mode = #tpu.pipeline_mode<synchronous>, transform_indices = @transform_8, window_bounds = array<i64: 1, 16>}, {transform_indices = @transform_9, window_bounds = array<i64: 1, 8, 32, 16>}]} {
    %c0 = arith.constant 0 : index
    %c0_0 = arith.constant 0 : index
    %0 = vector.load %arg5[%c0, %c0_0] : memref<16x4xbf16, #tpu.memory_space<vmem>>, vector<16x4xbf16>
    %c0_1 = arith.constant 0 : index
    %c0_2 = arith.constant 0 : index
    %1 = vector.load %arg8[%c0_1, %c0_2] : memref<32x4xf32, #tpu.memory_space<vmem>>, vector<32x4xf32>
    %c0_3 = arith.constant 0 : index
    %c0_4 = arith.constant 0 : index
    %c0_5 = arith.constant 0 : index
    %c0_6 = arith.constant 0 : index
    %2 = vector.load %arg2[%c0_3, %c0_4, %c0_5, %c0_6] : memref<1x8x32x16xbf16, #tpu.memory_space<vmem>>, vector<1x8x32x16xbf16>
    %3 = vector.shape_cast %2 : vector<1x8x32x16xbf16> to vector<8x32x16xbf16>
    %4 = vector.shape_cast %3 : vector<8x32x16xbf16> to vector<256x16xbf16>
    %cst = arith.constant dense<0.000000e+00> : vector<256x4xf32>
    %5 = tpu.matmul %4, %0, %cst {dimension_numbers = #tpu.dot_dimension_numbers<[1], [0], [0], [1], [0, 0, 1, 1], [], []>} : vector<256x16xbf16>, vector<16x4xbf16>, vector<256x4xf32> -> vector<256x4xf32>
    %6 = vector.shape_cast %5 : vector<256x4xf32> to vector<8x32x4xf32>
    %7 = vector.shape_cast %1 : vector<32x4xf32> to vector<1x32x4xf32>
    %8 = vector.broadcast %7 : vector<1x32x4xf32> to vector<8x32x4xf32>
    %9 = arith.addf %6, %8 : vector<8x32x4xf32>
    %cst_7 = arith.constant 0.000000e+00 : f32
    %10 = vector.broadcast %cst_7 : f32 to vector<8x32x4xf32>
    %11 = arith.maximumf %9, %10 : vector<8x32x4xf32>
    %12 = vector.shape_cast %11 : vector<8x32x4xf32> to vector<256x4xf32>
    %13 = arith.truncf %12 : vector<256x4xf32> to vector<256x4xbf16>
    %c49 = arith.constant 49 : index
    %c0_8 = arith.constant 0 : index
    %14 = vector.load %arg12[%c49, %c0_8] : memref<352x12xbf16, #tpu.memory_space<vmem>>, vector<256x4xbf16>
    tpu.vector_store %arg12[%c49, %c0_8], %13 {strides = array<i32>} : memref<352x12xbf16, #tpu.memory_space<vmem>>, vector<256x4xbf16>,
    %c48 = arith.constant 48 : index
    %c4 = arith.constant 4 : index
    %15 = vector.load %arg12[%c48, %c4] : memref<352x12xbf16, #tpu.memory_space<vmem>>, vector<256x4xbf16>
    tpu.vector_store %arg12[%c48, %c4], %13 {strides = array<i32>} : memref<352x12xbf16, #tpu.memory_space<vmem>>, vector<256x4xbf16>,
    %c47 = arith.constant 47 : index
    %c8 = arith.constant 8 : index
    %16 = vector.load %arg12[%c47, %c8] : memref<352x12xbf16, #tpu.memory_space<vmem>>, vector<256x4xbf16>
    tpu.vector_store %arg12[%c47, %c8], %13 {strides = array<i32>} : memref<352x12xbf16, #tpu.memory_space<vmem>>, vector<256x4xbf16>,
    %c0_i32 = arith.constant 0 : i32
    %17 = arith.cmpi sgt, %arg1, %c0_i32 : i32
    %18 = arith.extui %17 : i1 to i32
    %19 = arith.sitofp %18 : i32 to f32
    %c1_i32 = arith.constant 1 : i32
    %20 = arith.cmpi slt, %arg1, %c1_i32 : i32
    %21 = arith.extui %20 : i1 to i32
    %22 = arith.sitofp %21 : i32 to f32
    %c0_9 = arith.constant 0 : index
    %c0_10 = arith.constant 0 : index
    %c0_11 = arith.constant 0 : index
    %c0_12 = arith.constant 0 : index
    %23 = vector.load %arg3[%c0_9, %c0_10, %c0_11, %c0_12] : memref<1x1x32x16xbf16, #tpu.memory_space<vmem>>, vector<1x1x32x16xbf16>
    %24 = vector.shape_cast %23 : vector<1x1x32x16xbf16> to vector<32x16xbf16>
    %cst_13 = arith.constant dense<0.000000e+00> : vector<32x4xf32>
    %25 = tpu.matmul %24, %0, %cst_13 {dimension_numbers = #tpu.dot_dimension_numbers<[1], [0], [0], [1], [0, 0, 1, 1], [], []>} : vector<32x16xbf16>, vector<16x4xbf16>, vector<32x4xf32> -> vector<32x4xf32>
    %26 = vector.shape_cast %25 : vector<32x4xf32> to vector<1x32x4xf32>
    %27 = vector.shape_cast %1 : vector<32x4xf32> to vector<1x32x4xf32>
    %28 = arith.addf %26, %27 : vector<1x32x4xf32>
    %cst_14 = arith.constant 0.000000e+00 : f32
    %29 = vector.broadcast %cst_14 : f32 to vector<1x32x4xf32>
    %30 = arith.maximumf %28, %29 : vector<1x32x4xf32>
    %31 = vector.shape_cast %30 : vector<1x32x4xf32> to vector<32x4xf32>
    %32 = vector.broadcast %19 : f32 to vector<32x4xf32>
    %33 = arith.mulf %31, %32 : vector<32x4xf32>
    %34 = arith.truncf %33 : vector<32x4xf32> to vector<32x4xbf16>
    %c17 = arith.constant 17 : index
    %c0_15 = arith.constant 0 : index
    %35 = vector.load %arg12[%c17, %c0_15] : memref<352x12xbf16, #tpu.memory_space<vmem>>, vector<32x4xbf16>
    tpu.vector_store %arg12[%c17, %c0_15], %34 {strides = array<i32>} : memref<352x12xbf16, #tpu.memory_space<vmem>>, vector<32x4xbf16>,
    %c16 = arith.constant 16 : index
    %c4_16 = arith.constant 4 : index
    %36 = vector.load %arg12[%c16, %c4_16] : memref<352x12xbf16, #tpu.memory_space<vmem>>, vector<32x4xbf16>
    tpu.vector_store %arg12[%c16, %c4_16], %34 {strides = array<i32>} : memref<352x12xbf16, #tpu.memory_space<vmem>>, vector<32x4xbf16>,
    %c15 = arith.constant 15 : index
    %c8_17 = arith.constant 8 : index
    %37 = vector.load %arg12[%c15, %c8_17] : memref<352x12xbf16, #tpu.memory_space<vmem>>, vector<32x4xbf16>
    tpu.vector_store %arg12[%c15, %c8_17], %34 {strides = array<i32>} : memref<352x12xbf16, #tpu.memory_space<vmem>>, vector<32x4xbf16>,
    %c0_18 = arith.constant 0 : index
    %c0_19 = arith.constant 0 : index
    %c0_20 = arith.constant 0 : index
    %c0_21 = arith.constant 0 : index
    %38 = vector.load %arg4[%c0_18, %c0_19, %c0_20, %c0_21] : memref<1x1x32x16xbf16, #tpu.memory_space<vmem>>, vector<1x1x32x16xbf16>
    %39 = vector.shape_cast %38 : vector<1x1x32x16xbf16> to vector<32x16xbf16>
    %cst_22 = arith.constant dense<0.000000e+00> : vector<32x4xf32>
    %40 = tpu.matmul %39, %0, %cst_22 {dimension_numbers = #tpu.dot_dimension_numbers<[1], [0], [0], [1], [0, 0, 1, 1], [], []>} : vector<32x16xbf16>, vector<16x4xbf16>, vector<32x4xf32> -> vector<32x4xf32>
    %41 = vector.shape_cast %40 : vector<32x4xf32> to vector<1x32x4xf32>
    %42 = vector.shape_cast %1 : vector<32x4xf32> to vector<1x32x4xf32>
    %43 = arith.addf %41, %42 : vector<1x32x4xf32>
    %cst_23 = arith.constant 0.000000e+00 : f32
    %44 = vector.broadcast %cst_23 : f32 to vector<1x32x4xf32>
    %45 = arith.maximumf %43, %44 : vector<1x32x4xf32>
    %46 = vector.shape_cast %45 : vector<1x32x4xf32> to vector<32x4xf32>
    %47 = vector.broadcast %22 : f32 to vector<32x4xf32>
    %48 = arith.mulf %46, %47 : vector<32x4xf32>
    %49 = arith.truncf %48 : vector<32x4xf32> to vector<32x4xbf16>
    %c305 = arith.constant 305 : index
    %c0_24 = arith.constant 0 : index
    %50 = vector.load %arg12[%c305, %c0_24] : memref<352x12xbf16, #tpu.memory_space<vmem>>, vector<32x4xbf16>
    tpu.vector_store %arg12[%c305, %c0_24], %49 {strides = array<i32>} : memref<352x12xbf16, #tpu.memory_space<vmem>>, vector<32x4xbf16>,
    %c304 = arith.constant 304 : index
    %c4_25 = arith.constant 4 : index
    %51 = vector.load %arg12[%c304, %c4_25] : memref<352x12xbf16, #tpu.memory_space<vmem>>, vector<32x4xbf16>
    tpu.vector_store %arg12[%c304, %c4_25], %49 {strides = array<i32>} : memref<352x12xbf16, #tpu.memory_space<vmem>>, vector<32x4xbf16>,
    %c303 = arith.constant 303 : index
    %c8_26 = arith.constant 8 : index
    %52 = vector.load %arg12[%c303, %c8_26] : memref<352x12xbf16, #tpu.memory_space<vmem>>, vector<32x4xbf16>
    tpu.vector_store %arg12[%c303, %c8_26], %49 {strides = array<i32>} : memref<352x12xbf16, #tpu.memory_space<vmem>>, vector<32x4xbf16>,
    %cst_27 = arith.constant 0.000000e+00 : f32
    %53 = vector.broadcast %cst_27 : f32 to vector<256x4xf32>
    %c16_28 = arith.constant 16 : index
    %c0_29 = arith.constant 0 : index
    %54 = vector.load %arg12[%c16_28, %c0_29] : memref<352x12xbf16, #tpu.memory_space<vmem>>, vector<256x12xbf16>
    %c0_30 = arith.constant 0 : index
    %c0_31 = arith.constant 0 : index
    %c0_32 = arith.constant 0 : index
    %55 = vector.load %arg6[%c0_30, %c0_31, %c0_32] : memref<3x12x4xbf16, #tpu.memory_space<vmem>>, vector<1x12x4xbf16>
    %56 = vector.shape_cast %55 : vector<1x12x4xbf16> to vector<12x4xbf16>
    %cst_33 = arith.constant dense<0.000000e+00> : vector<256x4xf32>
    %57 = tpu.matmul %54, %56, %cst_33 {dimension_numbers = #tpu.dot_dimension_numbers<[1], [0], [0], [1], [0, 0, 1, 1], [], []>} : vector<256x12xbf16>, vector<12x4xbf16>, vector<256x4xf32> -> vector<256x4xf32>
    %58 = arith.addf %53, %57 : vector<256x4xf32>
    %c48_34 = arith.constant 48 : index
    %c0_35 = arith.constant 0 : index
    %59 = vector.load %arg12[%c48_34, %c0_35] : memref<352x12xbf16, #tpu.memory_space<vmem>>, vector<256x12xbf16>
    %c1 = arith.constant 1 : index
    %c0_36 = arith.constant 0 : index
    %c0_37 = arith.constant 0 : index
    %60 = vector.load %arg6[%c1, %c0_36, %c0_37] : memref<3x12x4xbf16, #tpu.memory_space<vmem>>, vector<1x12x4xbf16>
    %61 = vector.shape_cast %60 : vector<1x12x4xbf16> to vector<12x4xbf16>
    %cst_38 = arith.constant dense<0.000000e+00> : vector<256x4xf32>
    %62 = tpu.matmul %59, %61, %cst_38 {dimension_numbers = #tpu.dot_dimension_numbers<[1], [0], [0], [1], [0, 0, 1, 1], [], []>} : vector<256x12xbf16>, vector<12x4xbf16>, vector<256x4xf32> -> vector<256x4xf32>
    %63 = arith.addf %58, %62 : vector<256x4xf32>
    %c80 = arith.constant 80 : index
    %c0_39 = arith.constant 0 : index
    %64 = vector.load %arg12[%c80, %c0_39] : memref<352x12xbf16, #tpu.memory_space<vmem>>, vector<256x12xbf16>
    %c2 = arith.constant 2 : index
    %c0_40 = arith.constant 0 : index
    %c0_41 = arith.constant 0 : index
    %65 = vector.load %arg6[%c2, %c0_40, %c0_41] : memref<3x12x4xbf16, #tpu.memory_space<vmem>>, vector<1x12x4xbf16>
    %66 = vector.shape_cast %65 : vector<1x12x4xbf16> to vector<12x4xbf16>
    %cst_42 = arith.constant dense<0.000000e+00> : vector<256x4xf32>
    %67 = tpu.matmul %64, %66, %cst_42 {dimension_numbers = #tpu.dot_dimension_numbers<[1], [0], [0], [1], [0, 0, 1, 1], [], []>} : vector<256x12xbf16>, vector<12x4xbf16>, vector<256x4xf32> -> vector<256x4xf32>
    %68 = arith.addf %63, %67 : vector<256x4xf32>
    %c0_43 = arith.constant 0 : index
    %c0_44 = arith.constant 0 : index
    %69 = vector.load %arg9[%c0_43, %c0_44] : memref<1x4xf32, #tpu.memory_space<vmem>>, vector<1x4xf32>
    %70 = vector.broadcast %69 : vector<1x4xf32> to vector<256x4xf32>
    %71 = arith.addf %68, %70 : vector<256x4xf32>
    %cst_45 = arith.constant 0.000000e+00 : f32
    %72 = vector.broadcast %cst_45 : f32 to vector<256x4xf32>
    %73 = arith.maximumf %71, %72 : vector<256x4xf32>
    %74 = arith.truncf %73 : vector<256x4xf32> to vector<256x4xbf16>
    %c0_46 = arith.constant 0 : index
    %c0_47 = arith.constant 0 : index
    %75 = vector.load %arg7[%c0_46, %c0_47] : memref<4x16xbf16, #tpu.memory_space<vmem>>, vector<4x16xbf16>
    %cst_48 = arith.constant dense<0.000000e+00> : vector<256x16xf32>
    %76 = tpu.matmul %74, %75, %cst_48 {dimension_numbers = #tpu.dot_dimension_numbers<[1], [0], [0], [1], [0, 0, 1, 1], [], []>} : vector<256x4xbf16>, vector<4x16xbf16>, vector<256x16xf32> -> vector<256x16xf32>
    %c0_49 = arith.constant 0 : index
    %c0_50 = arith.constant 0 : index
    %77 = vector.load %arg10[%c0_49, %c0_50] : memref<1x16xf32, #tpu.memory_space<vmem>>, vector<1x16xf32>
    %78 = vector.broadcast %77 : vector<1x16xf32> to vector<256x16xf32>
    %79 = arith.addf %76, %78 : vector<256x16xf32>
    %80 = arith.extf %4 : vector<256x16xbf16> to vector<256x16xf32>
    %81 = arith.addf %79, %80 : vector<256x16xf32>
    %cst_51 = arith.constant 0.000000e+00 : f32
    %82 = vector.broadcast %cst_51 : f32 to vector<256x16xf32>
    %83 = arith.maximumf %81, %82 : vector<256x16xf32>
    %84 = vector.shape_cast %83 : vector<256x16xf32> to vector<8x32x16xf32>
    %85 = arith.truncf %84 : vector<8x32x16xf32> to vector<8x32x16xbf16>
    %c0_52 = arith.constant 0 : index
    %c0_53 = arith.constant 0 : index
    %c0_54 = arith.constant 0 : index
    %c0_55 = arith.constant 0 : index
    %86 = vector.load %arg11[%c0_52, %c0_53, %c0_54, %c0_55] : memref<1x8x32x16xbf16, #tpu.memory_space<vmem>>, vector<1x8x32x16xbf16>
    %87 = vector.shape_cast %86 : vector<1x8x32x16xbf16> to vector<8x32x16xbf16>
    %88 = vector.shape_cast %85 : vector<8x32x16xbf16> to vector<1x8x32x16xbf16>
    tpu.vector_store %arg11[%c0_52, %c0_53, %c0_54, %c0_55], %88 {strides = array<i32>} : memref<1x8x32x16xbf16, #tpu.memory_space<vmem>>, vector<1x8x32x16xbf16>,
    return
  }
  func.func @transform_0(%arg0: i32, %arg1: i32) -> (i32, i32, i32, i32) {
    %c0_i32 = arith.constant 0 : i32
    %c0_i32_0 = arith.constant 0 : i32
    %c0_i32_1 = arith.constant 0 : i32
    return %arg0, %arg1, %c0_i32, %c0_i32_0 : i32, i32, i32, i32
  }
  func.func @transform_1(%arg0: i32, %arg1: i32) -> (i32, i32, i32, i32) {
    %c8_i32 = arith.constant 8 : i32
    %0 = arith.muli %arg1, %c8_i32 : i32
    %c1_i32 = arith.constant 1 : i32
    %1 = arith.subi %0, %c1_i32 : i32
    %c0_i32 = arith.constant 0 : i32
    %2 = arith.maxsi %1, %c0_i32 : i32
    %c0_i32_0 = arith.constant 0 : i32
    %c0_i32_1 = arith.constant 0 : i32
    %c0_i32_2 = arith.constant 0 : i32
    return %arg0, %2, %c0_i32_0, %c0_i32_1 : i32, i32, i32, i32
  }
  func.func @transform_2(%arg0: i32, %arg1: i32) -> (i32, i32, i32, i32) {
    %c8_i32 = arith.constant 8 : i32
    %0 = arith.muli %arg1, %c8_i32 : i32
    %c8_i32_0 = arith.constant 8 : i32
    %1 = arith.addi %0, %c8_i32_0 : i32
    %c15_i32 = arith.constant 15 : i32
    %2 = arith.minsi %1, %c15_i32 : i32
    %c0_i32 = arith.constant 0 : i32
    %c0_i32_1 = arith.constant 0 : i32
    %c0_i32_2 = arith.constant 0 : i32
    return %arg0, %2, %c0_i32, %c0_i32_1 : i32, i32, i32, i32
  }
  func.func @transform_3(%arg0: i32, %arg1: i32) -> (i32, i32) {
    %c0_i32 = arith.constant 0 : i32
    %c0_i32_0 = arith.constant 0 : i32
    %c0_i32_1 = arith.constant 0 : i32
    return %c0_i32, %c0_i32_0 : i32, i32
  }
  func.func @transform_4(%arg0: i32, %arg1: i32) -> (i32, i32, i32) {
    %c0_i32 = arith.constant 0 : i32
    %c0_i32_0 = arith.constant 0 : i32
    %c0_i32_1 = arith.constant 0 : i32
    %c0_i32_2 = arith.constant 0 : i32
    return %c0_i32, %c0_i32_0, %c0_i32_1 : i32, i32, i32
  }
  func.func @transform_5(%arg0: i32, %arg1: i32) -> (i32, i32) {
    %c0_i32 = arith.constant 0 : i32
    %c0_i32_0 = arith.constant 0 : i32
    %c0_i32_1 = arith.constant 0 : i32
    return %c0_i32, %c0_i32_0 : i32, i32
  }
  func.func @transform_6(%arg0: i32, %arg1: i32) -> (i32, i32) {
    %c0_i32 = arith.constant 0 : i32
    %c0_i32_0 = arith.constant 0 : i32
    %c0_i32_1 = arith.constant 0 : i32
    return %c0_i32, %c0_i32_0 : i32, i32
  }
  func.func @transform_7(%arg0: i32, %arg1: i32) -> (i32, i32) {
    %c0_i32 = arith.constant 0 : i32
    %c0_i32_0 = arith.constant 0 : i32
    %c0_i32_1 = arith.constant 0 : i32
    return %c0_i32, %c0_i32_0 : i32, i32
  }
  func.func @transform_8(%arg0: i32, %arg1: i32) -> (i32, i32) {
    %c0_i32 = arith.constant 0 : i32
    %c0_i32_0 = arith.constant 0 : i32
    %c0_i32_1 = arith.constant 0 : i32
    return %c0_i32, %c0_i32_0 : i32, i32
  }
  func.func @transform_9(%arg0: i32, %arg1: i32) -> (i32, i32, i32, i32) {
    %c0_i32 = arith.constant 0 : i32
    %c0_i32_0 = arith.constant 0 : i32
    %c0_i32_1 = arith.constant 0 : i32
    return %arg0, %arg1, %c0_i32, %c0_i32_0 : i32, i32, i32, i32
  }
}

</mosaic_0001>

<bundles_post_ra>
// kernel: tpu_custom_call.1
= control target key start
LH: loop header
LB: loop body
LE: loop exit
PB: predicated region body
PF: predicated region fallthrough
CT: control target
= control target key end

     0   :  { %s3800_s30 = smov 0   ;;  %s3802_s10 = smov 0   ;;  %s5176_s0 = inlined_call_operand.vmem [shape: bf16[2,16,32,16], index: 0, kind: input, shape index: {}]   ;;  %s5177_s1 = inlined_call_operand.vmem [shape: bf16[2,16,32,16], index: 1, kind: input, shape index: {}]   ;;  %s5178_s2 = inlined_call_operand.vmem [shape: bf16[2,16,32,16], index: 2, kind: input, shape index: {}]   ;;  %s5179_s3 = inlined_call_operand.vmem [shape: bf16[16,4], index: 3, kind: input, shape index: {}]   ;;  %s5180_s4 = inlined_call_operand.vmem [shape: bf16[3,12,4], index: 4, kind: input, shape index: {}]   ;;  %s5181_s5 = inlined_call_operand.vmem [shape: bf16[4,16], index: 5, kind: input, shape index: {}]   ;;  %s5182_s6 = inlined_call_operand.vmem [shape: f32[32,4], index: 6, kind: input, shape index: {}]   ;;  %s5183_s7 = inlined_call_operand.vmem [shape: f32[1,4], index: 7, kind: input, shape index: {}]   ;;  %s5184_s8 = inlined_call_operand.vmem [shape: f32[1,16], index: 8, kind: input, shape index: {}]   ;;  %s5185_s9 = inlined_call_operand.vmem [shape: bf16[2,16,32,16], index: 9, kind: output, shape index: {}]  }
   0x1   :  { %s3804_s11 = smov 0   ;;  %s3806_s12 = smov 0  }
   0x2   :  { %s3808_s13 = smov 0  }
   0x3 LB: > { %s28_s14 = sadd.s32 1, %s3738_s11  ;;  %s31_s15 = sadd.s32 1, %s3742_s12  ;;  %s3746_s13 = sphi %s3808_s13, %s19_s13   ;;  %s3742_s12 = sphi %s3806_s12, %s5210_s12   ;;  %s3738_s11 = sphi %s3804_s11, %s5209_s11   ;;  %s3734_s10 = sphi %s3802_s10, %s5208_s10   ;;  %s3730_s30 = sphi %s3800_s30, %s5207_s30  }
   0x4   : > { %p29_p0 = scmp.ge.s32.totalorder %s28_s14, 2  ;;  %p3249_p1 = scmp.ge.s32.totalorder %s3746_s13, 1 }
   0x5   : > { %p373_p2 = scmp.lt.s32.totalorder %s3746_s13, 5 }
   0x6   : > { %s5212_s14 = smov (%p29_p0, %s28_s14), 0  ;;  %s5214_s15 = smov (!%p29_p0, %s31_s15), %s3742_s12 }
   0x7   : > { %p374_p3 = pnand %p3249_p1, %p373_p2  ;;  %p33_p4 = scmp.ge.s32.totalorder %s5214_s15, 2 }
   0x8   : > { %s3836_s18 = sshll.u32 (!%p374_p3), %s3730_s30, 3  ;;  %p446_p5 = scmp.lt.s32.totalorder (!%p374_p3), %s3734_s10, 1 }
   0x9   : > { %s5216_s15 = smov (%p33_p4, %s5214_s15), 0  ;;  %377 = sbr.rel (%p374_p3) target bundleno = 879 (0x36f), region = 56 }
   0xa   : > { %p448_p6 = scmp.lt.s32.totalorder (!%p374_p3), %s3836_s18, 15  ;;  %s3255_s27 = sadd.s32 (!%p374_p3), 4294967295, %s3836_s18 }
   0xb   : > { %p458_p7 = scmp.gt.s32.totalorder (!%p374_p3), %s3255_s27, 0  ;;  %p3256_p8 = scmp.lt.s32.totalorder (!%p374_p3), %s3255_s27, 15 }
   0xc   : > { %p1691_p10 = scmp.gt.s32.totalorder (!%p374_p3), %s3730_s30, 0  ;;  %p1694_p11 = scmp.lt.s32.totalorder (!%p374_p3), %s3730_s30, 1 }
   0xe   : > { %v3599_v0 = vld [vmem:[%s5179_s3] sm:$0xff]  ;;  %s5218_s10 = smov (!%p446_p5, %s3734_s10), 1  ;;  %vm626_vm0 = vcmask 130048   ;;  %s5220_s27 = smov (!%p458_p7, %s3255_s27), 0  ;;  %v3894_v17 = vld [vmem:[%s5182_s6 + $0x10] sm:$0xff]  ;;  %v3905_v27 = vld [vmem:[%s5182_s6 + $0x8] sm:$0xff] }
   0xf   : > { %682 = vmatpush.bf16.msra.mxu0 %v3599_v0  ;;  %3657 = vmatpush.bf16.msra.mxu1 %v3599_v0  ;;  %s449_s19 = scalar_select %p448_p6, %s3836_s18, 15  ;;  %v3889_v16 = vld [vmem:[%s5182_s6] sm:$0xff]  ;;  %v3911_v29 = vld [vmem:[%s5182_s6 + $0x18] sm:$0xff]  ;;  %vm1183_vm1 = vcmask 27648   ;;  %vm1184_vm2 = vsmask.f32 7938 }
  0x10   : > { %3658 = vmatpush.bf16.msra.mxu2 %v3599_v0  ;;  %s3840_s20 = sshll.u32 %s5218_s10, 6  ;;  %3659 = vmatpush.bf16.msra.mxu3 %v3599_v0  ;;  %s5222_s27 = smov (!%p3256_p8, %s5220_s27), 15  ;;  %vm3918_vm3 = vmand %vm1183_vm1, %vm1184_vm2  ;;  %v1186_v39 = vld [vmem:[#allocation2 + $0x18] sm:$0xf]  ;;  %vm1387_vm4 = vsmask.f32 3328 }
  0x11   : > { %s3251_s21 = sshll.u32 %s449_s19, 2  ;;  %s3261_s28 = sshll.u32 %s5222_s27, 2  ;;  %vm1388_vm5 = vsmask.f32 7440  ;;  %vm860_vm6 = vsmask.f32 256 }
  0x12   : > { %s3843_s22 = sadd.s32 %s3840_s20, %s3251_s21  ;;  %s466_s29 = sadd.s32 %s3261_s28, %s3840_s20  ;;  %vm861_vm7 = vsmask.f32 4368  ;;  %vm3946_vm8 = vmor %vm1387_vm4, %vm1388_vm5  ;;  %vm2208_vm10 = vcmask 1045504   ;;  %vm1354_vm11 = vcmask 60448   ;;  %vm1648_vm12 = vcmask 93251  }
  0x13   : > { %1724 = vmatpush.bf16.msrb.mxu1 %v3599_v0  ;;  %s3253_s23 = sshll.u32 %s3843_s22, 2  ;;  %s3263_s10 = sshll.u32 %s466_s29, 2  ;;  %vm3957_vm9 = vmor %vm860_vm6, %vm861_vm7  ;;  %vm1649_vm13 = vsmask.f32 7950  ;;  %vm1654_vm15 = vcmask 93248   ;;  %vm2159_vm5 = vcmask 97280  }
  0x14   : > { %1892 = vmatpush.bf16.msrb.mxu2 %v3599_v0  ;;  %s3851_s26 = scalar_lea.vmem %s5176_s0, %s3253_s23  ;;  %s468_s19 = scalar_lea.vmem %s5177_s1, %s3263_s10  ;;  %vm4337_vm14 = vmand %vm1648_vm12, %vm1649_vm13 }
  0x15   : > { %v3600_v1 = vld [vmem:[%s3851_s26] sm:$0xff]  ;;  %v3605_v2 = vld [vmem:[%s3851_s26 + $0x28] sm:$0xff]  ;;  %v3606_v5 = vld [vmem:[%s3851_s26 + $0x30] sm:$0xff]  ;;  %s3748_s10 = smov 4   ;;  %s474_s21 = sadd.s32 8, %s3836_s18 }
  0x16   : > { %3343 = vmatmul.msk.bf16.vlgmr.msra.gmra.mxu0 %vm626_vm0, %v3600_v1  ;;  %3348 = vmatmul.msk.bf16.vlgmr.msra.gmra.mxu1 %vm626_vm0, %v3605_v2  ;;  %v3608_v3 = vld [vmem:[%s3851_s26 + $0x40] sm:$0xff]  ;;  %v3601_v4 = vld [vmem:[%s3851_s26 + $0x8] sm:$0xff]  ;;  %v3602_v6 = vld [vmem:[%s3851_s26 + $0x10] sm:$0xff]  ;;  %p3996_p9 = scmp.lt.s32.totalorder %s474_s21, 15 }
  0x17   : > { %3351 = vmatmul.msk.bf16.vlgmr.msra.gmra.mxu2 %vm626_vm0, %v3608_v3  ;;  %v3607_v7 = vld [vmem:[%s3851_s26 + $0x38] sm:$0xff]  ;;  %v3609_v8 = vld [vmem:[%s3851_s26 + $0x48] sm:$0xff]  ;;  %v3616_v10 = vld [vmem:[%s468_s19] sm:$0xff]  ;;  %s4054_s18 = scalar_select %p1691_p10, 1, 0 }
  0x18   : > { %v3603_v9 = vld [vmem:[%s3851_s26 + $0x18] sm:$0xff]  ;;  %v3604_v11 = vld [vmem:[%s3851_s26 + $0x20] sm:$0xff]  ;;  %v3617_v12 = vld [vmem:[%s468_s19 + $0x8] sm:$0xff]  ;;  %s3749_s19 = smov 8   ;;  %s5224_s21 = smov (!%p3996_p9, %s474_s21), 15 }
  0x19   : > { %v3611_v13 = vld [vmem:[%s3851_s26 + $0x58] sm:$0xff]  ;;  %v3610_v14 = vld [vmem:[%s3851_s26 + $0x50] sm:$0xff]  ;;  %v3612_v15 = vld [vmem:[%s3851_s26 + $0x60] sm:$0xff]  ;;  %s5226_s21 = smov (!%p3996_p9, %s5224_s21), 15  ;;  %s1693_s28 = scvt.s32.f32 %s4054_s18 }
  0x1a   : > { %3354 = vmatmul.msk.bf16.vlgmr.msra.gmra.mxu3 %vm626_vm0, %v3611_v13  ;;  %v3613_v22 = vld [vmem:[%s3851_s26 + $0x68] sm:$0xff]  ;;  %v3614_v62 = vld [vmem:[%s3851_s26 + $0x70] sm:$0xff]  ;;  %s4061_s25 = sshll.u32 %s5226_s21, 2 }
  0x1b   : > { %s483_s27 = sadd.s32 %s4061_s25, %s3840_s20  ;;  %s5027_s20 = scalar_lea.vmem %s5185_s9, %s3253_s23 }
  0x1c   : > { %s3270_s29 = sshll.u32 %s483_s27, 2 }
  0x1d   : > { %s4116_s17 = scalar_lea.vmem %s5178_s2, %s3270_s29 }
  0x1e   : > { %s4621_s21 = scalar_select %p1694_p11, 1, 0 }
  0x20   : > { %s1696_s30 = scvt.s32.f32 %s4621_s21 }
  0x26   : > { %3344 = vmatmul.msk.bf16.gmra.mxu0 %vm626_vm0, %v3601_v4  ;;  %3349 = vmatmul.msk.bf16.gmra.mxu1 %vm626_vm0, %v3606_v5 }
  0x27   : > { %3352 = vmatmul.msk.bf16.gmra.mxu2 %vm626_vm0, %v3609_v8 }
  0x2a   : > { %3355 = vmatmul.msk.bf16.gmra.mxu3 %vm626_vm0, %v3612_v15 }
  0x36   : > { %3345 = vmatmul.msk.bf16.gmra.mxu0 %vm626_vm0, %v3602_v6  ;;  %3350 = vmatmul.msk.bf16.gmra.mxu1 %vm626_vm0, %v3607_v7 }
  0x37   : > { %3353 = vmatmul.msk.bf16.gmra.mxu2 %vm626_vm0, %v3610_v14 }
  0x3a   : > { %3356 = vmatmul.msk.bf16.gmra.mxu3 %vm626_vm0, %v3613_v22 }
  0x46   : > { %3346 = vmatmul.msk.bf16.gmra.mxu0 %vm626_vm0, %v3603_v9  ;;  %3367 = vmatmul.msk.bf16.vlgmr.msrb.gmra.mxu1 %vm626_vm0, %v3616_v10 }
  0x4a   : > { %3357 = vmatmul.msk.bf16.gmra.mxu3 %vm626_vm0, %v3614_v62 }
  0x56   : > { %3347 = vmatmul.msk.bf16.gmra.mxu0 %vm626_vm0, %v3604_v11  ;;  %3368 = vmatmul.msk.bf16.gmra.mxu1 %vm626_vm0, %v3617_v12 }
  0x93   : > { %v684_v18 = vpop.f32.mrf.mxu0  ;;  %v709_v19 = vpop.f32.mrf.mxu1 }
  0x94   : > { %v764_v20 = vadd.f32 %v684_v18, %v3889_v16  ;;  %v774_v21 = vadd.f32 %v709_v19, %v3894_v17 }
  0x96   : > { %v796_v23 = vmax.f32 %v764_v20, 0.0  ;;  %v806_v24 = vmax.f32 %v774_v21, 0.0 }
  0x98   : > { %v828_v25 = vpack.c.bf16 %v796_v23, %v796_v23  ;;  %v3900_v26 = vpack.c.bf16 %v806_v24, %v806_v24 }
  0x9a   : > { %v864_v28 = vshrl.u32 %v828_v25, 16  ;;  %1258 = vrot.lane.b32.xlu0 %v828_v25, %s3748_s10  ;;  %v956_v30 = vshll.u32 %v3900_v26, 16  ;;  %v867_v33 = vshll.u32 %v828_v25, 16  ;;  %v953_v35 = vshrl.u32 %v3900_v26, 16  ;;  %v724_v52 = vpop.f32.mrf.mxu2 }
  0x9b   : > { %v686_v31 = vpop.f32.mrf.mxu0  ;;  %v711_v32 = vpop.f32.mrf.mxu1  ;;  %v3952_v7 = vadd.f32 %v724_v52, %v3889_v16 }
  0x9c   : > { %v866_v34 = vrot.slane %v864_v28, 7  ;;  %v765_v36 = vadd.f32 %v686_v31, %v3905_v27  ;;  %v775_v37 = vadd.f32 %v711_v32, %v3911_v29  ;;  %v1441_v40 = vrot.slane %v953_v35, 4 }
  0x9d   : > { %v1390_v44 = vrot.slane %v867_v33, 5  ;;  %v1391_v45 = vrot.slane %v864_v28, 4  ;;  %v3924_v46 = vrot.slane %v956_v30, 5  ;;  %v3940_v63 = vrot.slane %v953_v35, 7 }
  0x9e   : > { %v797_v41 = vmax.f32 %v765_v36, 0.0  ;;  %v869_v42 = vor.u32 %v867_v33, %v866_v34  ;;  %v807_v43 = vmax.f32 %v775_v37, 0.0  ;;  %v870_v12 = vrot.slane %v866_v34, 4 }
  0x9f   : > { %v1392_v54 = vor.u32 %v1391_v45, %v1390_v44  ;;  %v1442_v57 = vor.u32 %v1441_v40, %v3924_v46  ;;  %v960_v18 = vrot.slane %v3940_v63, 4 }
  0xa0   : > { %v829_v47 = vpack.c.bf16 %v797_v41, %v797_v41  ;;  %v1187_v48 = vsel %vm3918_vm3, %v869_v42, %v1186_v39  ;;  %v3928_v49 = vpack.c.bf16 %v807_v43, %v807_v43 }
  0xa1   : > { %1188 = vst [vmem:[#allocation2 + $0x18] sm:$0xf] %v1187_v48  ;;  %v1393_v10 = vrot.slane %v1392_v54, 4  ;;  %v3962_v11 = vrot.slane %v1442_v57, 4 }
  0xa2   : > { %v872_v50 = vshrl.u32 %v829_v47, 16  ;;  %v875_v51 = vshll.u32 %v829_v47, 16  ;;  %1549 = vrot.lane.b32.xlu0 %v1390_v44, %s3749_s19  ;;  %1260 = vrot.lane.b32.xlu1 %v829_v47, %s3748_s10  ;;  %v962_v53 = vshrl.u32 %v3928_v49, 16  ;;  %v965_v59 = vshll.u32 %v3928_v49, 16 }
  0xa3   : > { %v689_v55 = vpop.f32.mrf.mxu0  ;;  %v714_v56 = vpop.f32.mrf.mxu1 }
  0xa4   : > { %v3934_v58 = vrot.slane %v872_v50, 7  ;;  %v766_v60 = vadd.f32 %v689_v55, %v3894_v17  ;;  %v776_v61 = vadd.f32 %v714_v56, %v3889_v16  ;;  %v3942_v0 = vrot.slane %v962_v53, 7 }
  0xa5   : > { %v1394_v2 = vrot.slane %v875_v51, 5  ;;  %v1396_v3 = vrot.slane %v872_v50, 4  ;;  %v3966_v15 = vrot.slane %v965_v59, 5  ;;  %v1446_v21 = vrot.slane %v962_v53, 4 }
  0xa6   : > { %v877_v4 = vor.u32 %v875_v51, %v3934_v58  ;;  %v798_v5 = vmax.f32 %v766_v60, 0.0  ;;  %v808_v6 = vmax.f32 %v776_v61, 0.0  ;;  %v967_v9 = vor.u32 %v965_v59, %v3942_v0 }
  0xa7   : > { %v1395_v19 = vsel %vm3946_vm8, %v1393_v10, %v1394_v2  ;;  %v1397_v20 = vor.u32 %v1396_v3, %v1394_v2  ;;  %v879_v33 = vrot.slane %v3934_v58, 4  ;;  %v1447_v35 = vor.u32 %v1446_v21, %v3966_v15 }
  0xa8   : > { %v830_v13 = vpack.c.bf16 %v798_v5, %v798_v5  ;;  %v3964_v14 = vpack.c.bf16 %v808_v6, %v808_v6  ;;  %v878_v22 = vsel %vm3957_vm9, %v870_v12, %v877_v4  ;;  %v968_v36 = vsel %vm3957_vm9, %v960_v18, %v967_v9  ;;  %v3615_v18 = vld [vmem:[%s3851_s26 + $0x78] sm:$0xff] }
  0xa9   : > { %1190 = vst.msk [vmem:[#allocation2 + $0x1c] sm:$0xf] %vm1183_vm1, %v878_v22  ;;  %v1398_v44 = vrot.slane %v1397_v20, 4  ;;  %v4002_v50 = vrot.slane %v1447_v35, 4  ;;  %v969_v55 = vrot.slane %v3942_v0, 4  ;;  %v812_v0 = vmax.f32 %v3952_v7, 0.0  ;;  %3358 = vmatmul.msk.bf16.gmra.mxu3 %vm626_vm0, %v3615_v18 }
  0xaa   : > { %v881_v23 = vshrl.u32 %v830_v13, 16  ;;  %v884_v24 = vshll.u32 %v830_v13, 16  ;;  %v971_v25 = vshrl.u32 %v3964_v14, 16  ;;  %v974_v28 = vshll.u32 %v3964_v14, 16  ;;  %1551 = vrot.lane.b32.xlu0 %v1395_v19, %s3749_s19  ;;  %1262 = vrot.lane.b32.xlu2 %v830_v13, %s3748_s10  ;;  %1200 = vst.msk [vmem:[#allocation2 + $0x44] sm:$0xf] %vm1183_vm1, %v968_v36 }
  0xab   : > { %v691_v31 = vpop.f32.mrf.mxu0  ;;  %v716_v32 = vpop.f32.mrf.mxu1 }
  0xac   : > { %v3987_v37 = vrot.slane %v881_v23, 7  ;;  %v1401_v39 = vrot.slane %v881_v23, 4  ;;  %v3989_v40 = vrot.slane %v971_v25, 7  ;;  %v1451_v41 = vrot.slane %v971_v25, 4 }
  0xad   : > { %v767_v42 = vadd.f32 %v691_v31, %v3911_v29  ;;  %v777_v43 = vadd.f32 %v716_v32, %v3905_v27  ;;  %v1399_v45 = vrot.slane %v884_v24, 5  ;;  %v4004_v51 = vrot.slane %v974_v28, 5 }
  0xae   : > { %v886_v47 = vor.u32 %v884_v24, %v3987_v37  ;;  %v976_v48 = vor.u32 %v974_v28, %v3989_v40  ;;  %v888_v2 = vrot.slane %v3987_v37, 4  ;;  %v978_v23 = vrot.slane %v3989_v40, 4 }
  0xaf   : > { %v799_v52 = vmax.f32 %v767_v42, 0.0  ;;  %v809_v53 = vmax.f32 %v777_v43, 0.0  ;;  %v1400_v54 = vsel %vm3946_vm8, %v1398_v44, %v1399_v45  ;;  %v1402_v56 = vor.u32 %v1401_v39, %v1399_v45 }
  0xb0   : > { %1553 = vrot.lane.b32.xlu1 %v1400_v54, %s3749_s19  ;;  %v887_v57 = vsel %vm3957_vm9, %v879_v33, %v886_v47  ;;  %v1452_v59 = vor.u32 %v1451_v41, %v4004_v51  ;;  %v977_v62 = vsel %vm3957_vm9, %v969_v55, %v976_v48  ;;  %v4071_v54 = vpack.c.bf16 %v812_v0, %v812_v0 }
  0xb1   : > { %v831_v60 = vpack.c.bf16 %v799_v52, %v799_v52  ;;  %v4017_v61 = vpack.c.bf16 %v809_v53, %v809_v53  ;;  %1191 = vst.msk [vmem:[#allocation2 + $0x20] sm:$0xf] %vm1183_vm1, %v887_v57  ;;  %v1403_v13 = vrot.slane %v1402_v56, 4 }
  0xb2   : > { %1201 = vst.msk [vmem:[#allocation2 + $0x48] sm:$0xf] %vm1183_vm1, %v977_v62  ;;  %v4038_v19 = vrot.slane %v1452_v59, 4 }
  0xb3   : > { %v890_v3 = vshrl.u32 %v831_v60, 16  ;;  %v893_v4 = vshll.u32 %v831_v60, 16  ;;  %v980_v5 = vshrl.u32 %v4017_v61, 16  ;;  %v983_v6 = vshll.u32 %v4017_v61, 16  ;;  %1264 = vrot.lane.b32.xlu0 %v831_v60, %s3748_s10  ;;  %v694_v9 = vpop.f32.mrf.mxu0  ;;  %v719_v10 = vpop.f32.mrf.mxu1 }
  0xb4   : > { %v768_v12 = vadd.f32 %v694_v9, %v3889_v16  ;;  %v778_v7 = vadd.f32 %v719_v10, %v3894_v17 }
  0xb5   : > { %v892_v20 = vrot.slane %v890_v3, 7  ;;  %v982_v21 = vrot.slane %v980_v5, 7  ;;  %v1404_v22 = vrot.slane %v893_v4, 5  ;;  %v4045_v28 = vrot.slane %v983_v6, 5 }
  0xb6   : > { %v800_v24 = vmax.f32 %v768_v12, 0.0  ;;  %v810_v25 = vmax.f32 %v778_v7, 0.0  ;;  %v1456_v31 = vrot.slane %v980_v5, 4  ;;  %v1406_v36 = vrot.slane %v890_v3, 4 }
  0xb7   : > { %v895_v32 = vor.u32 %v893_v4, %v892_v20  ;;  %v985_v33 = vor.u32 %v983_v6, %v982_v21  ;;  %v1405_v35 = vsel %vm3946_vm8, %v1403_v13, %v1404_v22  ;;  %v897_v56 = vrot.slane %v892_v20, 4 }
  0xb8   : > { %v832_v37 = vpack.c.bf16 %v800_v24, %v800_v24  ;;  %v4049_v39 = vpack.c.bf16 %v810_v25, %v810_v25  ;;  %1555 = vrot.lane.b32.xlu1 %v1405_v35, %s3749_s19  ;;  %v1457_v40 = vor.u32 %v1456_v31, %v4045_v28  ;;  %v1407_v55 = vor.u32 %v1406_v36, %v1404_v22 }
  0xb9   : > { %v896_v42 = vsel %vm3957_vm9, %v888_v2, %v895_v32  ;;  %v986_v43 = vsel %vm3957_vm9, %v978_v23, %v985_v33  ;;  %v987_v10 = vrot.slane %v982_v21, 4  ;;  %v5186_v31 = vshrl.u32 %v4071_v54, 16 }
  0xba   : > { %v899_v44 = vshrl.u32 %v832_v37, 16  ;;  %v902_v45 = vshll.u32 %v832_v37, 16  ;;  %v989_v47 = vshrl.u32 %v4049_v39, 16  ;;  %v992_v48 = vshll.u32 %v4049_v39, 16  ;;  %1266 = vrot.lane.b32.xlu2 %v832_v37, %s3748_s10  ;;  %1192 = vst.msk [vmem:[#allocation2 + $0x24] sm:$0xf] %vm1183_vm1, %v896_v42 }
  0xbb   : > { %v696_v52 = vpop.f32.mrf.mxu0  ;;  %v721_v53 = vpop.f32.mrf.mxu1  ;;  %1202 = vst.msk [vmem:[#allocation2 + $0x4c] sm:$0xf] %vm1183_vm1, %v986_v43  ;;  %v4087_v9 = vrot.slane %v1457_v40, 4  ;;  %v1408_v13 = vrot.slane %v1407_v55, 4  ;;  %v1010_v33 = vshll.u32 %v4071_v54, 16  ;;  %v4106_v35 = vstv %s1693_s28 }
  0xbc   : > { %v4074_v57 = vrot.slane %v899_v44, 7  ;;  %v1411_v59 = vrot.slane %v899_v44, 4  ;;  %v4076_v60 = vrot.slane %v989_v47, 7  ;;  %v1461_v62 = vrot.slane %v989_v47, 4 }
  0xbd   : > { %v769_v2 = vadd.f32 %v696_v52, %v3905_v27  ;;  %v779_v3 = vadd.f32 %v721_v53, %v3911_v29  ;;  %v1409_v4 = vrot.slane %v902_v45, 5  ;;  %v4082_v5 = vrot.slane %v992_v48, 5 }
  0xbe   : > { %v904_v0 = vor.u32 %v902_v45, %v4074_v57  ;;  %v994_v6 = vor.u32 %v992_v48, %v4076_v60  ;;  %v906_v36 = vrot.slane %v4074_v57, 4  ;;  %v996_v37 = vrot.slane %v4076_v60, 4 }
  0xbf   : > { %v801_v12 = vmax.f32 %v769_v2, 0.0  ;;  %v811_v7 = vmax.f32 %v779_v3, 0.0  ;;  %v1412_v18 = vor.u32 %v1411_v59, %v1409_v4  ;;  %v1462_v23 = vor.u32 %v1461_v62, %v4082_v5  ;;  %v3618_v3 = vld [vmem:[%s4116_s17] sm:$0xff] }
  0xc0   : > { %v905_v22 = vsel %vm3957_vm9, %v897_v56, %v904_v0  ;;  %v995_v24 = vsel %vm3957_vm9, %v987_v10, %v994_v6  ;;  %v1410_v32 = vsel %vm3946_vm8, %v1408_v13, %v1409_v4  ;;  %3377 = vmatmul.msk.bf16.vlgmr.msrb.gmra.mxu2 %vm626_vm0, %v3618_v3 }
  0xc1   : > { %v833_v25 = vpack.c.bf16 %v801_v12, %v801_v12  ;;  %v4098_v21 = vpack.c.bf16 %v811_v7, %v811_v7  ;;  %1193 = vst.msk [vmem:[#allocation2 + $0x28] sm:$0xf] %vm1183_vm1, %v905_v22  ;;  %v1413_v53 = vrot.slane %v1412_v18, 4  ;;  %v4120_v55 = vrot.slane %v1462_v23, 4 }
  0xc2   : > { %1557 = vrot.lane.b32.xlu2 %v1410_v32, %s3749_s19  ;;  %1203 = vst.msk [vmem:[#allocation2 + $0x50] sm:$0xf] %vm1183_vm1, %v995_v24  ;;  %v4137_v24 = vrot.slane %v1010_v33, 5 }
  0xc3   : > { %v908_v40 = vshrl.u32 %v833_v25, 16  ;;  %v911_v42 = vshll.u32 %v833_v25, 16  ;;  %v998_v43 = vshrl.u32 %v4098_v21, 16  ;;  %v1001_v44 = vshll.u32 %v4098_v21, 16  ;;  %v699_v45 = vpop.f32.mrf.mxu0  ;;  %v1726_v47 = vpop.f32.mrf.mxu1 }
  0xc4   : > { %v770_v48 = vadd.f32 %v699_v45, %v3894_v17  ;;  %v1736_v52 = vadd.f32 %v1726_v47, %v3889_v16 }
  0xc5   : > { %v910_v56 = vrot.slane %v908_v40, 7  ;;  %v1000_v57 = vrot.slane %v998_v43, 7  ;;  %v1414_v59 = vrot.slane %v911_v42, 5  ;;  %v1416_v60 = vrot.slane %v908_v40, 4 }
  0xc6   : > { %v802_v62 = vmax.f32 %v770_v48, 0.0  ;;  %v1740_v2 = vmax.f32 %v1736_v52, 0.0  ;;  %v4123_v4 = vrot.slane %v1001_v44, 5  ;;  %v1466_v0 = vrot.slane %v998_v43, 4 }
  0xc7   : > { %v913_v6 = vor.u32 %v911_v42, %v910_v56  ;;  %v1003_v10 = vor.u32 %v1001_v44, %v1000_v57  ;;  %v1415_v12 = vsel %vm3946_vm8, %v1413_v53, %v1414_v59  ;;  %v1417_v7 = vor.u32 %v1416_v60, %v1414_v59 }
  0xc8   : > { %v4127_v13 = vpack.c.bf16 %v802_v62, %v802_v62  ;;  %v1745_v18 = vmul.f32 %v4106_v35, %v1740_v2  ;;  %1559 = vrot.lane.b32.xlu0 %v1415_v12, %s3749_s19  ;;  %v1467_v23 = vor.u32 %v1466_v0, %v4123_v4  ;;  %v4145_v42 = vrot.slane %v5186_v31, 7 }
  0xc9   : > { %v914_v32 = vsel %vm3957_vm9, %v906_v36, %v913_v6  ;;  %v1004_v40 = vsel %vm3957_vm9, %v996_v37, %v1003_v10  ;;  %v1418_v59 = vrot.slane %v1417_v7, 4  ;;  %v1005_v10 = vrot.slane %v1000_v57, 4 }
  0xca   : > { %v917_v43 = vshrl.u32 %v4127_v13, 16  ;;  %v920_v44 = vshll.u32 %v4127_v13, 16  ;;  %v1749_v45 = vpack.c.bf16 %v1745_v18, %v1745_v18  ;;  %1268 = vrot.lane.b32.xlu2 %v833_v25, %s3748_s10  ;;  %1194 = vst.msk [vmem:[#allocation2 + $0x2c] sm:$0xf] %vm1183_vm1, %v914_v32  ;;  %v4151_v52 = vrot.slane %v1467_v23, 4 }
  0xcb   : > { %v701_v47 = vpop.f32.mrf.mxu0  ;;  %v1728_v48 = vpop.f32.mrf.mxu1  ;;  %1204 = vst.msk [vmem:[#allocation2 + $0x54] sm:$0xf] %vm1183_vm1, %v1004_v40  ;;  %v1012_v3 = vor.u32 %v1010_v33, %v4145_v42  ;;  %v1793_v23 = vld [vmem:[#allocation2 + $0x8] sm:$0xf]  ;;  %v915_v32 = vrot.slane %v910_v56, 4 }
  0xcc   : > { %v919_v36 = vrot.slane %v917_v43, 7  ;;  %v1754_v37 = vshrl.u32 %v1749_v45, 16  ;;  %v1757_v53 = vshll.u32 %v1749_v45, 16  ;;  %v771_v60 = vadd.f32 %v701_v47, %v3911_v29 }
  0xcd   : > { %v1737_v62 = vadd.f32 %v1728_v48, %v3905_v27  ;;  %v4158_v2 = vrot.slane %v920_v44, 5  ;;  %v1013_v56 = vsel %vm3957_vm9, %v1005_v10, %v1012_v3 }
  0xce   : > { %v922_v0 = vor.u32 %v920_v44, %v919_v36  ;;  %v1756_v6 = vrot.slane %v1754_v37, 7  ;;  %v803_v12 = vmax.f32 %v771_v60, 0.0  ;;  %v4173_v57 = vrot.slane %v1757_v53, 5  ;;  %1205 = vst.msk [vmem:[#allocation2 + $0x58] sm:$0xf] %vm1183_vm1, %v1013_v56 }
  0xcf   : > { %v1741_v18 = vmax.f32 %v1737_v62, 0.0  ;;  %v1420_v7 = vsel %vm3946_vm8, %v1418_v59, %v4158_v2  ;;  %v1823_v44 = vrot.slane %v1754_v37, 4 }
  0xd0   : > { %v1759_v40 = vor.u32 %v1757_v53, %v1756_v6  ;;  %1561 = vrot.lane.b32.xlu1 %v1420_v7, %s3749_s19  ;;  %v835_v47 = vpack.c.bf16 %v803_v12, %v803_v12  ;;  %v923_v33 = vsel %vm3957_vm9, %v915_v32, %v922_v0 }
  0xd1   : > { %v1746_v48 = vmul.f32 %v4106_v35, %v1741_v18  ;;  %1195 = vst.msk [vmem:[#allocation2 + $0x30] sm:$0xf] %vm1183_vm1, %v923_v33  ;;  %v1824_v10 = vor.u32 %v1823_v44, %v4173_v57 }
  0xd2   : > { %1806 = vrot.lane.b32.xlu2 %v1749_v45, %s3748_s10  ;;  %v1794_v60 = vsel %vm3918_vm3, %v1759_v40, %v1793_v23  ;;  %v926_v59 = vshrl.u32 %v835_v47, 16  ;;  %v929_v53 = vshll.u32 %v835_v47, 16  ;;  %v924_v40 = vrot.slane %v919_v36, 4 }
  0xd3   : > { %v704_v62 = vpop.f32.mrf.mxu0  ;;  %v1731_v12 = vpop.f32.mrf.mxu1  ;;  %v1750_v18 = vpack.c.bf16 %v1746_v48, %v1746_v48  ;;  %1795 = vst [vmem:[#allocation2 + $0x8] sm:$0xf] %v1794_v60  ;;  %v1825_v20 = vrot.slane %v1824_v10, 4 }
  0xd4   : > { %v772_v0 = vadd.f32 %v704_v62, %v3889_v16  ;;  %v1738_v45 = vadd.f32 %v1731_v12, %v3894_v17  ;;  %v928_v37 = vrot.slane %v926_v59, 7  ;;  %v1760_v12 = vrot.slane %v1756_v6, 4 }
  0xd5   : > { %v1762_v7 = vshrl.u32 %v1750_v18, 16  ;;  %1808 = vrot.lane.b32.xlu0 %v1750_v18, %s3748_s10  ;;  %v1765_v23 = vshll.u32 %v1750_v18, 16  ;;  %v4189_v22 = vrot.slane %v929_v53, 5  ;;  %v1426_v41 = vrot.slane %v926_v59, 4  ;;  %v3619_v18 = vld [vmem:[%s4116_s17 + $0x8] sm:$0xff] }
  0xd6   : > { %v804_v32 = vmax.f32 %v772_v0, 0.0  ;;  %v1742_v3 = vmax.f32 %v1738_v45, 0.0  ;;  %v931_v48 = vor.u32 %v929_v53, %v928_v37  ;;  %3378 = vmatmul.msk.bf16.gmra.mxu2 %vm626_vm0, %v3619_v18  ;;  %vm1221_vm0 = vcmask 24576  }
  0xd7   : > { %v1764_v33 = vrot.slane %v1762_v7, 7  ;;  %v1826_v60 = vrot.slane %v1765_v23, 5  ;;  %v1828_v62 = vrot.slane %v1762_v7, 4  ;;  %vm4413_vm2 = vmand %vm1221_vm0, %vm860_vm6 }
  0xd8   : > { %v4185_v25 = vpack.c.bf16 %v804_v32, %v804_v32  ;;  %v1747_v56 = vmul.f32 %v4106_v35, %v1742_v3  ;;  %1272 = vrot.lane.b32.xlu1 %v835_v47, %s3748_s10  ;;  %v932_v44 = vsel %vm3957_vm9, %v924_v40, %v931_v48  ;;  %v1421_v40 = vrot.slane %v917_v43, 4  ;;  %vm4676_vm6 = vmand %vm1654_vm15, %vm1387_vm4 }
  0xd9   : > { %v1767_v0 = vor.u32 %v1765_v23, %v1764_v33  ;;  %v1829_v7 = vor.u32 %v1828_v62, %v1826_v60  ;;  %1196 = vst.msk [vmem:[#allocation2 + $0x34] sm:$0xf] %vm1183_vm1, %v932_v44  ;;  %v1427_v62 = vor.u32 %v1426_v41, %v4189_v22  ;;  %vm2844_vm4 = vcmask 1041408  }
  0xda   : > { %v935_v36 = vshrl.u32 %v4185_v25, 16  ;;  %v4195_v45 = vpack.c.bf16 %v1747_v56, %v1747_v56  ;;  %v938_v59 = vshll.u32 %v4185_v25, 16 }
  0xdb   : > { %v706_v32 = vpop.f32.mrf.mxu0  ;;  %v1733_v3 = vpop.f32.mrf.mxu1  ;;  %v1768_v6 = vsel %vm3957_vm9, %v1760_v12, %v1767_v0  ;;  %v1830_v18 = vrot.slane %v1829_v7, 4  ;;  %v1422_v7 = vor.u32 %v1421_v40, %v4158_v2 }
  0xdc   : > { %v937_v47 = vrot.slane %v935_v36, 7  ;;  %v1771_v53 = vshrl.u32 %v4195_v45, 16  ;;  %v1774_v23 = vshll.u32 %v4195_v45, 16  ;;  %1796 = vst.msk [vmem:[#allocation2 + $0xc] sm:$0xf] %vm1183_vm1, %v1768_v6  ;;  %v773_v48 = vadd.f32 %v706_v32, %v3905_v27 }
  0xdd   : > { %v1739_v10 = vadd.f32 %v1733_v3, %v3911_v29  ;;  %1270 = vrot.lane.b32.xlu0 %v4127_v13, %s3748_s10  ;;  %v1827_v6 = vsel %vm3946_vm8, %v1825_v20, %v1826_v60  ;;  %v1429_v32 = vrot.slane %v938_v59, 5  ;;  %v933_v13 = vrot.slane %v928_v37, 4 }
  0xde   : > { %v940_v56 = vor.u32 %v938_v59, %v937_v47  ;;  %v4212_v12 = vrot.slane %v1771_v53, 7  ;;  %v1831_v0 = vrot.slane %v1774_v23, 5  ;;  %v805_v44 = vmax.f32 %v773_v48, 0.0 }
  0xdf   : > { %v1743_v58 = vmax.f32 %v1739_v10, 0.0  ;;  %v1833_v3 = vrot.slane %v1771_v53, 4  ;;  %v1428_v48 = vrot.slane %v1427_v62, 4  ;;  %v1769_v10 = vrot.slane %v1764_v33, 4 }
  0xe0   : > { %1843 = vrot.lane.b32.xlu1 %v1827_v6, %s3749_s19  ;;  %v1832_v43 = vsel %vm3946_vm8, %v1830_v18, %v1831_v0  ;;  %v837_v34 = vpack.c.bf16 %v805_v44, %v805_v44  ;;  %v1776_v31 = vor.u32 %v1774_v23, %v4212_v12  ;;  %v941_v20 = vsel %vm3957_vm9, %v933_v13, %v940_v56 }
  0xe1   : > { %v1748_v41 = vmul.f32 %v4106_v35, %v1743_v58  ;;  %1845 = vrot.lane.b32.xlu2 %v1832_v43, %s3749_s19  ;;  %1197 = vst.msk [vmem:[#allocation2 + $0x38] sm:$0xf] %vm1183_vm1, %v941_v20  ;;  %v1430_v37 = vsel %vm3946_vm8, %v1428_v48, %v1429_v32  ;;  %v1834_v58 = vor.u32 %v1833_v3, %v1831_v0  ;;  %v1423_v23 = vrot.slane %v1422_v7, 4 }
  0xe2   : > { %v944_v60 = vshrl.u32 %v837_v34, 16  ;;  %v1777_v35 = vsel %vm3957_vm9, %v1769_v10, %v1776_v31  ;;  %v947_v59 = vshll.u32 %v837_v34, 16  ;;  %v942_v18 = vrot.slane %v937_v47, 4  ;;  %v3447_v47 = vld [vmem:[%s5180_s4 + $0x8] sm:$0xf] }
  0xe3   : > { %v4225_v6 = vpack.c.bf16 %v1748_v41, %v1748_v41  ;;  %1797 = vst.msk [vmem:[#allocation2 + $0x10] sm:$0xf] %vm1183_vm1, %v1777_v35  ;;  %v1431_v31 = vrot.slane %v935_v36, 4  ;;  %v1425_v0 = vsel %vm3946_vm8, %v1423_v23, %v4189_v22  ;;  %v1835_v44 = vrot.slane %v1834_v58, 4  ;;  %v3639_v36 = vld [vmem:[%s5180_s4 + $0x8] sm:$0x30]  ;;  %v726_v35 = vpop.f32.mrf.mxu2 }
  0xe4   : > { %v946_v2 = vrot.slane %v944_v60, 7  ;;  %v958_v3 = vor.u32 %v956_v30, %v3940_v63  ;;  %v3448_v13 = vor.u32 %v3639_v36, %v3447_v47  ;;  %v1436_v58 = vrot.slane %v944_v60, 4 }
  0xe5   : > { %1565 = vrot.lane.b32.xlu0 %v1430_v37, %s3749_s19  ;;  %v1783_v33 = vshll.u32 %v4225_v6, 16  ;;  %v1780_v53 = vshrl.u32 %v4225_v6, 16  ;;  %v1432_v63 = vor.u32 %v1431_v31, %v1429_v32  ;;  %v1434_v37 = vrot.slane %v947_v59, 5 }
  0xe6   : > { %v949_v40 = vor.u32 %v947_v59, %v946_v2  ;;  %v951_v43 = vrot.slane %v946_v2, 4  ;;  %v2210_v48 = vsel %vm2208_vm10, %v3448_v13, 0  ;;  %v781_v59 = vadd.f32 %v726_v35, %v3905_v27  ;;  %v1651_v13 = vld [vmem:[#allocation2 + $0x14] sm:$0x8] }
  0xe7   : > { %v1836_v62 = vrot.slane %v1783_v33, 5  ;;  %v1838_v56 = vrot.slane %v1780_v53, 4  ;;  %2219 = vmatpush.bf16.msrb.mxu3 %v2210_v48  ;;  %v1433_v20 = vrot.slane %v1432_v63, 4  ;;  %v1437_v2 = vor.u32 %v1436_v58, %v1434_v37 }
  0xe8   : > { %1812 = vrot.lane.b32.xlu1 %v4225_v6, %s3748_s10  ;;  %v950_v22 = vsel %vm3957_vm9, %v942_v18, %v949_v40  ;;  %v959_v7 = vsel %vm3957_vm9, %v951_v43, %v958_v3  ;;  %v4274_v40 = vpop.f32.mrf.mxu3  ;;  %v5195_v18 = vsel %vm3946_vm8, %v3962_v11, %v3966_v15  ;;  %v5197_v11 = vsel %vm3946_vm8, %v4087_v9, %v4082_v5 }
  0xe9   : > { %1563 = vrot.lane.b32.xlu2 %v1425_v0, %s3749_s19  ;;  %v1839_v41 = vor.u32 %v1838_v56, %v1836_v62  ;;  %v1837_v30 = vsel %vm3946_vm8, %v1835_v44, %v1836_v62  ;;  %1198 = vst.msk [vmem:[#allocation2 + $0x3c] sm:$0xf] %vm1183_vm1, %v950_v22  ;;  %v1435_v32 = vsel %vm3946_vm8, %v1433_v20, %v1434_v37  ;;  %v1438_v23 = vrot.slane %v1437_v2, 4 }
  0xea   : > { %1199 = vst.msk [vmem:[#allocation2 + $0x40] sm:$0xf] %vm1183_vm1, %v959_v7  ;;  %v813_v56 = vmax.f32 %v781_v59, 0.0  ;;  %v5198_v5 = vsel %vm3946_vm8, %v4038_v19, %v4045_v28 }
  0xeb   : > { %v1840_v10 = vrot.slane %v1839_v41, 4  ;;  %v1440_v60 = vsel %vm3946_vm8, %v1438_v23, %v3924_v46 }
  0xec   : > { %v845_v0 = vpack.c.bf16 %v813_v56, %v813_v56 }
  0xed   : > { %1847 = vrot.lane.b32.xlu0 %v1837_v30, %s3749_s19  ;;  %v1778_v30 = vrot.slane %v4212_v12, 4 }
  0xee   : > { %v1016_v3 = vshrl.u32 %v845_v0, 16 }
  0xf0   : > { %1810 = vrot.lane.b32.xlu1 %v4195_v45, %s3748_s10  ;;  %v729_v45 = vpop.f32.mrf.mxu2  ;;  %v1018_v36 = vrot.slane %v1016_v3, 7  ;;  %v1476_v23 = vrot.slane %v1016_v3, 4 }
  0xf1   : > { %1849 = vrot.lane.b32.xlu2 %v1840_v10, %s3749_s19  ;;  %v782_v46 = vadd.f32 %v729_v45, %v3894_v17  ;;  %v5196_v17 = vsel %vm3946_vm8, %v4002_v50, %v4004_v51  ;;  %v4323_v50 = vrot.slane %v1780_v53, 7  ;;  %v5201_v10 = vsel %vm3946_vm8, %v4120_v55, %v4123_v4 }
  0xf2   : > { %v1023_v2 = vrot.slane %v1018_v36, 4 }
  0xf3   : > { %v1785_v9 = vor.u32 %v1783_v33, %v4323_v50 }
  0xf5   : > { %1567 = vrot.lane.b32.xlu0 %v1435_v32, %s3749_s19  ;;  %v1786_v37 = vsel %vm3957_vm9, %v1778_v30, %v1785_v9  ;;  %v1014_v32 = vrot.slane %v4145_v42, 4 }
  0xf8   : > { %1274 = vrot.lane.b32.xlu1 %v4185_v25, %s3748_s10  ;;  %v5194_v25 = vshrl.u32 %v4071_v54, 16  ;;  %v731_v31 = vpop.f32.mrf.mxu2 }
  0xf9   : > { %1276 = vrot.lane.b32.xlu2 %v837_v34, %s3748_s10  ;;  %v783_v43 = vadd.f32 %v731_v31, %v3911_v29 }
  0xfa   : > { %v4286_v34 = vrot.slane %v5194_v25, 4 }
  0xfb   : > { %v815_v51 = vmax.f32 %v783_v43, 0.0 }
  0xfd   : > { %1280 = vrot.lane.b32.xlu0 %v3928_v49, %s3748_s10  ;;  %v4293_v49 = vpop.f32.mrf.mxu3  ;;  %v4345_v28 = vpack.c.bf16 %v815_v51, %v815_v51 }
  0xff   : > { %v1034_v55 = vshrl.u32 %v4345_v28, 16 }
 0x100   : > { %1569 = vrot.lane.b32.xlu1 %v1440_v60, %s3749_s19  ;;  %v734_v41 = vpop.f32.mrf.mxu2 }
 0x101   : > { %1278 = vrot.lane.b32.xlu2 %v3900_v26, %s3748_s10  ;;  %v1472_v26 = vor.u32 %v4286_v34, %v4137_v24  ;;  %v784_v12 = vadd.f32 %v734_v41, %v3889_v16  ;;  %v1037_v16 = vshll.u32 %v4345_v28, 16  ;;  %v1036_v3 = vrot.slane %v1034_v55, 7 }
 0x103   : > { %v816_v4 = vmax.f32 %v784_v12, 0.0  ;;  %v4387_v56 = vrot.slane %v1037_v16, 5  ;;  %v1039_v34 = vor.u32 %v1037_v16, %v1036_v3 }
 0x104   : > { %v1263_v62 = vpop.permute.xlu2 %1262 }
 0x105   : > { %1357 = vst.msk [vmem:[#allocation2 + $0x20] sm:$0xf] %vm1354_vm11, %v1263_v62  ;;  %1282 = vrot.lane.b32.xlu0 %v3964_v14, %s3748_s10  ;;  %v814_v14 = vmax.f32 %v782_v46, 0.0  ;;  %v4319_v47 = vpop.f32.mrf.mxu3  ;;  %v4385_v46 = vpack.c.bf16 %v816_v4, %v816_v4 }
 0x107   : > { %v4317_v15 = vpack.c.bf16 %v814_v14, %v814_v14  ;;  %v1046_v51 = vshll.u32 %v4385_v46, 16 }
 0x108   : > { %1571 = vrot.lane.b32.xlu1 %v5195_v18, %s3749_s19  ;;  %v736_v42 = vpop.f32.mrf.mxu2  ;;  %v1486_v18 = vrot.slane %v1034_v55, 4 }
 0x109   : > { %1573 = vrot.lane.b32.xlu2 %v5196_v17, %s3749_s19  ;;  %v1025_v29 = vshrl.u32 %v4317_v15, 16  ;;  %v1028_v7 = vshll.u32 %v4317_v15, 16  ;;  %v785_v31 = vadd.f32 %v736_v42, %v3905_v27  ;;  %v3475_v27 = vld [vmem:[%s5180_s4] sm:$0xf] }
 0x10b   : > { %v4341_v22 = vrot.slane %v1025_v29, 7  ;;  %v1481_v43 = vrot.slane %v1025_v29, 4  ;;  %v1473_v29 = vrot.slane %v1472_v26, 4  ;;  %v817_v41 = vmax.f32 %v785_v31, 0.0 }
 0x10c   : > { %v1259_v44 = vpop.permute.xlu0 %1258  ;;  %v1479_v30 = vrot.slane %v1028_v7, 5 }
 0x10d   : > { %1355 = vst.msk [vmem:[#allocation2 + $0x18] sm:$0xf] %vm1354_vm11, %v1259_v44  ;;  %1577 = vrot.lane.b32.xlu0 %v5197_v11, %s3749_s19  ;;  %v4357_v20 = vpop.f32.mrf.mxu3  ;;  %v1030_v58 = vor.u32 %v1028_v7, %v4341_v22  ;;  %v3636_v11 = vld [vmem:[%s5180_s4] sm:$0x30]  ;;  %v4429_v12 = vpack.c.bf16 %v817_v41, %v817_v41  ;;  %v1032_v55 = vrot.slane %v4341_v22, 4 }
 0x10f   : > { %v1031_v45 = vsel %vm3957_vm9, %v1023_v2, %v1030_v58  ;;  %v1482_v58 = vor.u32 %v1481_v43, %v1479_v30  ;;  %v1055_v22 = vshll.u32 %v4429_v12, 16  ;;  %v1052_v31 = vshrl.u32 %v4429_v12, 16 }
 0x110   : > { %1284 = vrot.lane.b32.xlu1 %v4017_v61, %s3748_s10  ;;  %v1019_v61 = vshll.u32 %v845_v0, 16  ;;  %1207 = vst.msk [vmem:[#allocation2 + $0x60] sm:$0xf] %vm1183_vm1, %v1031_v45  ;;  %v4459_v45 = vld [vmem:[%s5182_s6 + $0x18] sm:$0xff] }
 0x111   : > { %1575 = vrot.lane.b32.xlu2 %v5198_v5, %s3749_s19  ;;  %v1483_v42 = vrot.slane %v1482_v58, 4  ;;  %v1494_v43 = vrot.slane %v1055_v22, 5 }
 0x112   : > { %v1021_v48 = vor.u32 %v1019_v61, %v1018_v36  ;;  %v1474_v25 = vrot.slane %v1019_v61, 5  ;;  %v3476_v36 = vor.u32 %v3636_v11, %v3475_v27 }
 0x114   : > { %v1550_v63 = vpop.permute.xlu0 %1549  ;;  %v1261_v19 = vpop.permute.xlu1 %1260  ;;  %v1022_v35 = vsel %vm3957_vm9, %v1014_v32, %v1021_v48  ;;  %v1477_v17 = vor.u32 %v1476_v23, %v1474_v25  ;;  %v4436_v32 = vld [vmem:[%s5182_s6 + $0x10] sm:$0xff] }
 0x115   : > { %v1652_v6 = vsel %vm4337_vm14, %v1550_v63, %v1651_v13  ;;  %1356 = vst.msk [vmem:[#allocation2 + $0x1c] sm:$0xf] %vm1354_vm11, %v1261_v19  ;;  %v1267_v33 = vpop.permute.xlu2 %1266  ;;  %1579 = vrot.lane.b32.xlu0 %v5201_v10, %s3749_s19  ;;  %v4391_v44 = vpop.f32.mrf.mxu3  ;;  %v1043_v13 = vshrl.u32 %v4385_v46, 16 }
 0x116   : > { %1653 = vst [vmem:[#allocation2 + $0x14] sm:$0x8] %v1652_v6  ;;  %v1478_v61 = vrot.slane %v1477_v17, 4 }
 0x117   : > { %1798 = vst.msk [vmem:[#allocation2 + $0x14] sm:$0xf] %vm1183_vm1, %v1786_v37  ;;  %v4421_v63 = vrot.slane %v1043_v13, 7  ;;  %v1491_v10 = vrot.slane %v1043_v13, 4 }
 0x118   : > { %1359 = vst.msk [vmem:[#allocation2 + $0x28] sm:$0xf] %vm1354_vm11, %v1267_v33  ;;  %1286 = vrot.lane.b32.xlu1 %v4049_v39, %s3748_s10  ;;  %v3561_v39 = vld [vmem:[%s5180_s4 + $0x10] sm:$0xf]  ;;  %v1489_v33 = vrot.slane %v1046_v51, 5  ;;  %v1480_v37 = vsel %vm3946_vm8, %v1478_v61, %v1479_v30 }
 0x119   : > { %1288 = vrot.lane.b32.xlu2 %v4098_v21, %s3748_s10  ;;  %1206 = vst.msk [vmem:[#allocation2 + $0x5c] sm:$0xf] %vm1183_vm1, %v1022_v35  ;;  %v3656_v21 = vld [vmem:[%s5180_s4 + $0x10] sm:$0x30]  ;;  %v1048_v16 = vor.u32 %v1046_v51, %v4421_v63  ;;  %v1054_v51 = vrot.slane %v1052_v31, 7 }
 0x11a   : > { %v3562_v59 = vor.u32 %v3656_v21, %v3561_v39  ;;  %v1492_v23 = vor.u32 %v1491_v10, %v1489_v33  ;;  %v1041_v39 = vrot.slane %v1036_v3, 4  ;;  %v1485_v3 = vsel %vm3946_vm8, %v1483_v42, %v4387_v56 }
 0x11b   : > { %v1057_v61 = vor.u32 %v1055_v22, %v1054_v51 }
 0x11c   : > { %v1552_v60 = vpop.permute.xlu0 %1551  ;;  %v2583_v14 = vsel %vm2208_vm10, %v3562_v59, 0  ;;  %v4468_v59 = vld [vmem:[%s5182_s6] sm:$0xff] }
 0x11d   : > { %1655 = vst.msk [vmem:[#allocation2 + $0x18] sm:$0xf] %vm1654_vm15, %v1552_v60  ;;  %v1558_v62 = vpop.permute.xlu2 %1557  ;;  %1292 = vrot.lane.b32.xlu0 %v845_v0, %s3748_s10  ;;  %2592 = vmatpush.bf16.msra.mxu2 %v2583_v14  ;;  %v5202_v0 = vsel %vm3946_vm8, %v4151_v52, %v4137_v24  ;;  %v1487_v52 = vor.u32 %v1486_v18, %v4387_v56  ;;  %v1787_v24 = vrot.slane %v4323_v50, 4  ;;  %v4449_v35 = vpop.f32.mrf.mxu3 }
 0x11e   : > { %v1475_v50 = vsel %vm3946_vm8, %v1473_v29, %v1474_v25  ;;  %v787_v60 = vadd.f32 %v4459_v45, %v4293_v49  ;;  %v1049_v25 = vsel %vm3957_vm9, %v1041_v39, %v1048_v16  ;;  %v4481_v49 = vld [vmem:[%s5182_s6 + $0x8] sm:$0xff] }
 0x11f   : > { %v1488_v7 = vrot.slane %v1487_v52, 4  ;;  %1209 = vst.msk [vmem:[#allocation2 + $0x68] sm:$0xf] %vm1183_vm1, %v1049_v25  ;;  %v789_v14 = vadd.f32 %v4481_v49, %v4357_v20  ;;  %v1496_v20 = vrot.slane %v1052_v31, 4  ;;  %v791_v31 = vadd.f32 %v4459_v45, %v4449_v35 }
 0x120   : > { %1581 = vrot.lane.b32.xlu1 %v5202_v0, %s3749_s19  ;;  %v819_v27 = vmax.f32 %v787_v60, 0.0 }
 0x121   : > { %1290 = vrot.lane.b32.xlu2 %v4071_v54, %s3748_s10  ;;  %v2323_v54 = vsel %vm2208_vm10, %v3476_v36, 0  ;;  %v1490_v4 = vsel %vm3946_vm8, %v1488_v7, %v1489_v33  ;;  %v821_v52 = vmax.f32 %v789_v14, 0.0  ;;  %v1497_v30 = vor.u32 %v1496_v20, %v1494_v43 }
 0x122   : > { %v1554_v9 = vpop.permute.xlu1 %1553  ;;  %2332 = vmatpush.bf16.msra.mxu1 %v2323_v54  ;;  %v851_v41 = vpack.c.bf16 %v819_v27, %v819_v27 }
 0x123   : > { %1656 = vst.msk [vmem:[#allocation2 + $0x1c] sm:$0xf] %vm1654_vm15, %v1554_v9  ;;  %v4506_v54 = vpack.c.bf16 %v821_v52, %v821_v52  ;;  %v823_v52 = vmax.f32 %v791_v31, 0.0 }
 0x124   : > { %v1799_v26 = vld [vmem:[#allocation2 + $0x18] sm:$0x1] }
 0x125   : > { %v1800_v19 = vsel %vm4413_vm2, %v1787_v24, %v1799_v26  ;;  %v1265_v48 = vpop.permute.xlu0 %1264  ;;  %v1269_v6 = vpop.permute.xlu2 %1268  ;;  %1294 = vrot.lane.b32.xlu0 %v4317_v15, %s3748_s10  ;;  %v786_v15 = vadd.f32 %v4436_v32, %v4274_v40  ;;  %v1040_v40 = vsel %vm3957_vm9, %v1032_v55, %v1039_v34  ;;  %v1088_v58 = vshrl.u32 %v4506_v54, 16 }
 0x126   : > { %1801 = vst [vmem:[#allocation2 + $0x18] sm:$0x1] %v1800_v19  ;;  %v4500_v9 = vpop.f32.mrf.mxu3  ;;  %v1050_v19 = vrot.slane %v4421_v63, 4  ;;  %v1091_v63 = vshll.u32 %v4506_v54, 16 }
 0x127   : > { %1358 = vst.msk [vmem:[#allocation2 + $0x24] sm:$0xf] %vm1354_vm11, %v1265_v48  ;;  %v818_v21 = vmax.f32 %v786_v15, 0.0  ;;  %v1070_v48 = vshrl.u32 %v851_v41, 16  ;;  %v1516_v25 = vrot.slane %v1088_v58, 4 }
 0x128   : > { %1658 = vst.msk [vmem:[#allocation2 + $0x24] sm:$0xf] %vm1654_vm15, %v1558_v62  ;;  %1583 = vrot.lane.b32.xlu1 %v1475_v50, %s3749_s19  ;;  %v788_v62 = vadd.f32 %v4468_v59, %v4319_v47  ;;  %v1493_v47 = vrot.slane %v1492_v23, 4  ;;  %v1058_v10 = vsel %vm3957_vm9, %v1050_v19, %v1057_v61  ;;  %v4534_v60 = vrot.slane %v1091_v63, 5 }
 0x129   : > { %1360 = vst.msk [vmem:[#allocation2 + $0x2c] sm:$0xf] %vm1354_vm11, %v1269_v6  ;;  %1585 = vrot.lane.b32.xlu2 %v1480_v37, %s3749_s19  ;;  %v4488_v0 = vpack.c.bf16 %v818_v21, %v818_v21  ;;  %v1073_v6 = vshll.u32 %v851_v41, 16  ;;  %v1059_v37 = vrot.slane %v1054_v51, 4  ;;  %v1072_v16 = vrot.slane %v1070_v48, 7 }
 0x12a   : > { %v1556_v2 = vpop.permute.xlu1 %1555  ;;  %1208 = vst.msk [vmem:[#allocation2 + $0x64] sm:$0xf] %vm1183_vm1, %v1040_v40  ;;  %v820_v29 = vmax.f32 %v788_v62, 0.0  ;;  %v1495_v56 = vsel %vm3946_vm8, %v1493_v47, %v1494_v43  ;;  %v1506_v40 = vrot.slane %v1070_v48, 4 }
 0x12b   : > { %1657 = vst.msk [vmem:[#allocation2 + $0x20] sm:$0xf] %vm1654_vm15, %v1556_v2  ;;  %v1061_v11 = vshrl.u32 %v4488_v0, 16  ;;  %v1064_v13 = vshll.u32 %v4488_v0, 16 }
 0x12c   : > { %v852_v24 = vpack.c.bf16 %v820_v29, %v820_v29  ;;  %1210 = vst.msk [vmem:[#allocation2 + $0x6c] sm:$0xf] %vm1183_vm1, %v1058_v10 }
 0x12d   : > { %v1807_v18 = vpop.permute.xlu2 %1806  ;;  %v4473_v17 = vld [vmem:[#allocation2 + $0x18] sm:$0xff]  ;;  %1589 = vrot.lane.b32.xlu0 %v1490_v4, %s3749_s19  ;;  %v4498_v36 = vrot.slane %v1061_v11, 7  ;;  %v1501_v26 = vrot.slane %v1061_v11, 4  ;;  %v1499_v7 = vrot.slane %v1064_v13, 5  ;;  %v1517_v11 = vor.u32 %v1516_v25, %v4534_v60 }
 0x12e   : > { %1818 = vst.msk [vmem:[#allocation2 + $0x8] sm:$0xf] %vm1354_vm11, %v1807_v18  ;;  %3449 = vmatmul.msk.bf16.vlgmr.msrb.gmra.mxu3 %vm2159_vm5, %v4473_v17  ;;  %v1079_v50 = vshrl.u32 %v852_v24, 16  ;;  %v1082_v4 = vshll.u32 %v852_v24, 16  ;;  %v756_v21 = vpop.f32.mrf.mxu3  ;;  %v1075_v18 = vor.u32 %v1073_v6, %v1072_v16 }
 0x12f   : > { %v1066_v34 = vor.u32 %v1064_v13, %v4498_v36  ;;  %v1502_v39 = vor.u32 %v1501_v26, %v1499_v7  ;;  %v1068_v29 = vrot.slane %v4498_v36, 4  ;;  %v1077_v13 = vrot.slane %v1072_v16, 4 }
 0x130   : > { %1296 = vrot.lane.b32.xlu1 %v4345_v28, %s3748_s10  ;;  %v790_v28 = vadd.f32 %v4436_v32, %v4391_v44  ;;  %v1498_v44 = vrot.slane %v1497_v30, 4  ;;  %v4523_v2 = vrot.slane %v1079_v50, 7  ;;  %v1509_v20 = vrot.slane %v1082_v4, 5 }
 0x131   : > { %1587 = vrot.lane.b32.xlu2 %v1485_v3, %s3749_s19  ;;  %v1067_v55 = vsel %vm3957_vm9, %v1059_v37, %v1066_v34  ;;  %v1503_v3 = vrot.slane %v1502_v39, 4  ;;  %v793_v19 = vadd.f32 %v4481_v49, %v756_v21 }
 0x132   : > { %v822_v33 = vmax.f32 %v790_v28, 0.0  ;;  %1211 = vst.msk [vmem:[#allocation2 + $0x70] sm:$0xf] %vm1183_vm1, %v1067_v55  ;;  %v1500_v23 = vsel %vm3946_vm8, %v1498_v44, %v1499_v7  ;;  %v4529_v42 = vld [vmem:[#allocation2 + $0x20] sm:$0xff]  ;;  %v1084_v14 = vor.u32 %v1082_v4, %v4523_v2  ;;  %v1518_v28 = vrot.slane %v1517_v11, 4 }
 0x134   : > { %v4525_v22 = vpack.c.bf16 %v822_v33, %v822_v33  ;;  %v1085_v34 = vsel %vm3957_vm9, %v1077_v13, %v1084_v14 }
 0x135   : > { %1591 = vrot.lane.b32.xlu0 %v1495_v56, %s3749_s19  ;;  %v1076_v56 = vsel %vm3957_vm9, %v1068_v29, %v1075_v18  ;;  %1213 = vst.msk [vmem:[#allocation2 + $0x78] sm:$0xf] %vm1183_vm1, %v1085_v34 }
 0x136   : > { %v1097_v47 = vshrl.u32 %v4525_v22, 16  ;;  %v1100_v43 = vshll.u32 %v4525_v22, 16  ;;  %1212 = vst.msk [vmem:[#allocation2 + $0x74] sm:$0xf] %vm1183_vm1, %v1076_v56  ;;  %v759_v48 = vpop.f32.mrf.mxu3 }
 0x138   : > { %1298 = vrot.lane.b32.xlu1 %v4385_v46, %s3748_s10  ;;  %v1521_v61 = vrot.slane %v1097_v47, 4  ;;  %v1519_v36 = vrot.slane %v1100_v43, 5  ;;  %v4590_v21 = vrot.slane %v1097_v47, 7 }
 0x139   : > { %1300 = vrot.lane.b32.xlu2 %v4429_v12, %s3748_s10  ;;  %v1504_v12 = vrot.slane %v1073_v6, 5  ;;  %v4565_v6 = vpack.c.bf16 %v823_v52, %v823_v52 }
 0x13a   : > { %v1560_v15 = vpop.permute.xlu0 %1559  ;;  %v1520_v33 = vsel %vm3946_vm8, %v1518_v28, %v1519_v36  ;;  %v1522_v44 = vor.u32 %v1521_v61, %v1519_v36 }
 0x13b   : > { %1659 = vst.msk [vmem:[#allocation2 + $0x28] sm:$0xf] %vm1654_vm15, %v1560_v15  ;;  %v1846_v46 = vpop.permute.xlu2 %1845  ;;  %v1507_v62 = vor.u32 %v1506_v40, %v1504_v12  ;;  %v825_v15 = vmax.f32 %v793_v19, 0.0  ;;  %v1109_v55 = vshll.u32 %v4565_v6, 16  ;;  %v1106_v16 = vshrl.u32 %v4565_v6, 16 }
 0x13c   : > { %v794_v40 = vadd.f32 %v4436_v32, %v759_v48 }
 0x13d   : > { %1304 = vrot.lane.b32.xlu0 %v851_v41, %s3748_s10  ;;  %v1508_v51 = vrot.slane %v1507_v62, 4  ;;  %v1511_v41 = vrot.slane %v1079_v50, 4  ;;  %v4592_v62 = vpack.c.bf16 %v825_v15, %v825_v15  ;;  %v1526_v14 = vrot.slane %v1106_v16, 4 }
 0x13e   : > { %3450 = vmatmul.msk.bf16.gmra.mxu3 %vm2159_vm5, %v4529_v42  ;;  %v761_v47 = vpop.f32.mrf.mxu3  ;;  %v826_v11 = vmax.f32 %v794_v40, 0.0 }
 0x13f   : > { %v1510_v30 = vsel %vm3946_vm8, %v1508_v51, %v1509_v20  ;;  %v1512_v10 = vor.u32 %v1511_v41, %v1509_v20  ;;  %v1124_v31 = vshrl.u32 %v4592_v62, 16  ;;  %v795_v29 = vadd.f32 %v4459_v45, %v761_v47 }
 0x140   : > { %1593 = vrot.lane.b32.xlu1 %v1500_v23, %s3749_s19  ;;  %v1523_v23 = vrot.slane %v1522_v44, 4  ;;  %v4627_v56 = vpack.c.bf16 %v826_v11, %v826_v11  ;;  %v1104_v11 = vrot.slane %v4590_v21, 4 }
 0x141   : > { %1302 = vrot.lane.b32.xlu2 %v4488_v0, %s3748_s10  ;;  %v1505_v0 = vsel %vm3946_vm8, %v1503_v3, %v1504_v12  ;;  %v1127_v3 = vshll.u32 %v4592_v62, 16  ;;  %v1536_v61 = vrot.slane %v1124_v31, 4 }
 0x142   : > { %v1562_v27 = vpop.permute.xlu1 %1561  ;;  %v1136_v19 = vshll.u32 %v4627_v56, 16 }
 0x143   : > { %1660 = vst.msk [vmem:[#allocation2 + $0x2c] sm:$0xf] %vm1654_vm15, %v1562_v27  ;;  %v1564_v35 = vpop.permute.xlu2 %1563  ;;  %v1894_v13 = vpop.f32.mrf.mxu2  ;;  %v4631_v41 = vrot.slane %v1127_v3, 5 }
 0x144   : > { %v1904_v28 = vadd.f32 %v4468_v59, %v1894_v13 }
 0x145   : > { %1306 = vrot.lane.b32.xlu0 %v852_v24, %s3748_s10  ;;  %v792_v24 = vadd.f32 %v4468_v59, %v4500_v9  ;;  %v1090_v9 = vrot.slane %v1088_v58, 7  ;;  %v1524_v58 = vrot.slane %v1109_v55, 5 }
 0x147   : > { %v1809_v26 = vpop.permute.xlu0 %1808  ;;  %v824_v4 = vmax.f32 %v792_v24, 0.0  ;;  %v1525_v51 = vsel %vm3946_vm8, %v1523_v23, %v1524_v58  ;;  %v1527_v52 = vor.u32 %v1526_v14, %v1524_v58 }
 0x148   : > { %1819 = vst.msk [vmem:[#allocation2 + $0xc] sm:$0xf] %vm1354_vm11, %v1809_v26  ;;  %1595 = vrot.lane.b32.xlu1 %v1505_v0, %s3749_s19 }
 0x149   : > { %1860 = vst.msk [vmem:[#allocation2 + $0xc] sm:$0xf] %vm1654_vm15, %v1846_v46  ;;  %1597 = vrot.lane.b32.xlu2 %v1510_v30, %s3749_s19  ;;  %v1513_v46 = vrot.slane %v1512_v10, 4  ;;  %v4604_v18 = vpack.c.bf16 %v824_v4, %v824_v4  ;;  %v827_v30 = vmax.f32 %v795_v29, 0.0  ;;  %v1528_v34 = vrot.slane %v1527_v52, 4 }
 0x14a   : > { %v1273_v50 = vpop.permute.xlu1 %1272  ;;  %v3640_v7 = vld [vmem:[#allocation2 + $0x28] sm:$0xff]  ;;  %v4656_v10 = vstv %s1696_s30  ;;  %v1133_v52 = vshrl.u32 %v4627_v56, 16 }
 0x14b   : > { %1362 = vst.msk [vmem:[#allocation2 + $0x34] sm:$0xf] %vm1354_vm11, %v1273_v50  ;;  %v4576_v37 = vpop.permute.xlu2 %1849  ;;  %3563 = vmatmul.msk.bf16.vlgmr.msra.gmra.mxu2 %vm2159_vm5, %v3640_v7  ;;  %v4583_v12 = vld [vmem:[#allocation2 + $0x28] sm:$0xff]  ;;  %v1515_v39 = vsel %vm3946_vm8, %v1513_v46, %v4534_v60  ;;  %v1093_v60 = vor.u32 %v1091_v63, %v1090_v9  ;;  %v1102_v63 = vor.u32 %v1100_v43, %v4590_v21  ;;  %v1095_v43 = vrot.slane %v1090_v9, 4  ;;  %v1896_v47 = vpop.f32.mrf.mxu2 }
 0x14c   : > { %v1115_v59 = vshrl.u32 %v4604_v18, 16  ;;  %v1537_v50 = vor.u32 %v1536_v61, %v4631_v41  ;;  %v1908_v7 = vmax.f32 %v1904_v28, 0.0  ;;  %v4654_v44 = vpack.c.bf16 %v827_v30, %v827_v30 }
 0x14d   : > { %1601 = vrot.lane.b32.xlu0 %v1520_v33, %s3749_s19  ;;  %v1103_v36 = vsel %vm3957_vm9, %v1095_v43, %v1102_v63  ;;  %v1108_v33 = vrot.slane %v1106_v16, 7  ;;  %v4667_v16 = vrot.slane %v1136_v19, 5  ;;  %v1541_v28 = vrot.slane %v1133_v52, 4 }
 0x14e   : > { %3451 = vmatmul.msk.bf16.gmra.mxu3 %vm2159_vm5, %v4583_v12  ;;  %1215 = vst.msk [vmem:[#allocation2 + $0x80] sm:$0xf] %vm1183_vm1, %v1103_v36  ;;  %v4663_v46 = vrot.slane %v1115_v59, 7  ;;  %v1538_v9 = vrot.slane %v1537_v50, 4  ;;  %v1531_v61 = vrot.slane %v1115_v59, 4 }
 0x14f   : > { %v1271_v25 = vpop.permute.xlu0 %1270  ;;  %v1113_v21 = vrot.slane %v1108_v33, 4 }
 0x150   : > { %1361 = vst.msk [vmem:[#allocation2 + $0x30] sm:$0xf] %vm1354_vm11, %v1271_v25  ;;  %1308 = vrot.lane.b32.xlu1 %v4506_v54, %s3748_s10  ;;  %v1086_v54 = vrot.slane %v4523_v2, 4  ;;  %v1111_v25 = vor.u32 %v1109_v55, %v1108_v33  ;;  %v1542_v33 = vor.u32 %v1541_v28, %v4667_v16 }
 0x151   : > { %1661 = vst.msk [vmem:[#allocation2 + $0x30] sm:$0xf] %vm1654_vm15, %v1564_v35  ;;  %1599 = vrot.lane.b32.xlu2 %v1515_v39, %s3749_s19  ;;  %v1118_v35 = vshll.u32 %v4604_v18, 16  ;;  %v1913_v39 = vmul.f32 %v4656_v10, %v1908_v7 }
 0x152   : > { %v1844_v27 = vpop.permute.xlu1 %1843  ;;  %v1094_v2 = vsel %vm3957_vm9, %v1086_v54, %v1093_v60  ;;  %v1142_v60 = vshrl.u32 %v4654_v44, 16 }
 0x153   : > { %1859 = vst.msk [vmem:[#allocation2 + $0x8] sm:$0xf] %vm1654_vm15, %v1844_v27  ;;  %v1277_v20 = vpop.permute.xlu2 %1276  ;;  %v4643_v26 = vrot.slane %v1118_v35, 5  ;;  %v1540_v27 = vsel %vm3946_vm8, %v1538_v9, %v4667_v16  ;;  %v4697_v63 = vpack.c.bf16 %v1913_v39, %v1913_v39 }
 0x154   : > { %1364 = vst.msk [vmem:[#allocation2 + $0x3c] sm:$0xf] %vm1354_vm11, %v1277_v20  ;;  %v1546_v29 = vrot.slane %v1142_v60, 4 }
 0x155   : > { %1603 = vrot.lane.b32.xlu0 %v1525_v51, %s3749_s19  ;;  %1214 = vst.msk [vmem:[#allocation2 + $0x7c] sm:$0xf] %vm1183_vm1, %v1094_v2  ;;  %v1530_v15 = vsel %vm3946_vm8, %v1528_v34, %v4643_v26  ;;  %v1925_v13 = vshll.u32 %v4697_v63, 16  ;;  %v1532_v50 = vor.u32 %v1531_v61, %v4643_v26 }
 0x157   : > { %v1566_v0 = vpop.permute.xlu0 %1565  ;;  %v1990_v34 = vrot.slane %v1925_v13, 5  ;;  %v1533_v9 = vrot.slane %v1532_v50, 4 }
 0x158   : > { %1662 = vst.msk [vmem:[#allocation2 + $0x34] sm:$0xf] %vm1654_vm15, %v1566_v0  ;;  %1310 = vrot.lane.b32.xlu1 %v4525_v22, %s3748_s10 }
 0x159   : > { %1312 = vrot.lane.b32.xlu2 %v4565_v6, %s3748_s10  ;;  %v1120_v6 = vor.u32 %v1118_v35, %v4663_v46  ;;  %v1112_v35 = vsel %vm3957_vm9, %v1104_v11, %v1111_v25  ;;  %v1535_v26 = vsel %vm3946_vm8, %v1533_v9, %v4631_v41  ;;  %v1122_v25 = vrot.slane %v4663_v46, 4 }
 0x15a   : > { %v1813_v48 = vpop.permute.xlu1 %1812  ;;  %v3620_v24 = vld [vmem:[#allocation2 + $0x8] sm:$0xff]  ;;  %1216 = vst.msk [vmem:[#allocation2 + $0x84] sm:$0xf] %vm1183_vm1, %v1112_v35 }
 0x15b   : > { %1821 = vst.msk [vmem:[#allocation2 + $0x14] sm:$0xf] %vm1354_vm11, %v1813_v48  ;;  %v1279_v22 = vpop.permute.xlu2 %1278  ;;  %3477 = vmatmul.msk.bf16.vlgmr.msra.gmra.mxu1 %vm2159_vm5, %v3620_v24  ;;  %v1121_v2 = vsel %vm3957_vm9, %v1113_v21, %v1120_v6  ;;  %v1126_v48 = vrot.slane %v1124_v31, 7  ;;  %v1899_v6 = vpop.f32.mrf.mxu2 }
 0x15c   : > { %1365 = vst.msk [vmem:[#allocation2 + $0x40] sm:$0xf] %vm1354_vm11, %v1279_v22  ;;  %v1922_v22 = vshrl.u32 %v4697_v63, 16 }
 0x15d   : > { %1314 = vrot.lane.b32.xlu0 %v4604_v18, %s3748_s10  ;;  %v1145_v18 = vshll.u32 %v4654_v44, 16  ;;  %1217 = vst.msk [vmem:[#allocation2 + $0x88] sm:$0xf] %vm1183_vm1, %v1121_v2 }
 0x15e   : > { %v1991_v39 = vrot.slane %v1922_v22, 4  ;;  %v1924_v50 = vrot.slane %v1922_v22, 7 }
 0x15f   : > { %v1848_v4 = vpop.permute.xlu0 %1847  ;;  %v4669_v40 = vld [vmem:[#allocation2 + $0x30] sm:$0xff]  ;;  %v1544_v20 = vrot.slane %v1145_v18, 5 }
 0x160   : > { %v3641_v23 = vld [vmem:[#allocation2 + $0x30] sm:$0xff]  ;;  %1605 = vrot.lane.b32.xlu1 %v1530_v15, %s3749_s19  ;;  %3452 = vmatmul.msk.bf16.gmra.mxu3 %vm2159_vm5, %v4669_v40  ;;  %v4727_v15 = vrot.slane %v1133_v52, 7  ;;  %v1992_v11 = vor.u32 %v1991_v39, %v1990_v34 }
 0x161   : > { %3564 = vmatmul.msk.bf16.gmra.mxu2 %vm2159_vm5, %v3641_v23  ;;  %1320 = vrot.lane.b32.xlu2 %v4654_v44, %s3748_s10  ;;  %v1547_v0 = vor.u32 %v1546_v29, %v1544_v20  ;;  %v1543_v23 = vrot.slane %v1542_v33, 4 }
 0x162   : > { %v1862_v55 = vld [vmem:[#allocation2 + $0x14] sm:$0xf]  ;;  %v1811_v14 = vpop.permute.xlu1 %1810 }
 0x163   : > { %v1863_v51 = vsel %vm4676_vm6, %v4576_v37, %v1862_v55  ;;  %1820 = vst.msk [vmem:[#allocation2 + $0x10] sm:$0xf] %vm1354_vm11, %v1811_v14  ;;  %v1574_v54 = vpop.permute.xlu2 %1573  ;;  %v1905_v37 = vadd.f32 %v4481_v49, %v1896_v47  ;;  %v1548_v59 = vrot.slane %v1547_v0, 4  ;;  %v1131_v14 = vrot.slane %v1126_v48, 4  ;;  %v1901_v2 = vpop.f32.mrf.mxu2 }
 0x164   : > { %1864 = vst [vmem:[#allocation2 + $0x14] sm:$0xf] %v1863_v51  ;;  %v1545_v47 = vsel %vm3946_vm8, %v1543_v23, %v1544_v20  ;;  %v1906_v51 = vadd.f32 %v4436_v32, %v1899_v6  ;;  %v1144_v32 = vrot.slane %v1142_v60, 7  ;;  %v2790_v60 = vld [vmem:[%s5181_s5] sm:$0x3] }
 0x165   : > { %1861 = vst.msk [vmem:[#allocation2 + $0x10] sm:$0xf] %vm1654_vm15, %v1848_v4  ;;  %1609 = vrot.lane.b32.xlu0 %v1540_v27, %s3749_s19  ;;  %v1909_v36 = vmax.f32 %v1905_v37, 0.0  ;;  %v1129_v4 = vor.u32 %v1127_v3, %v1126_v48  ;;  %v2846_v28 = vsel %vm2844_vm4, %v2790_v60, 0 }
 0x166   : > { %v1910_v37 = vmax.f32 %v1906_v51, 0.0  ;;  %2855 = vmatpush.bf16.msrb.mxu0 %v2846_v28 }
 0x167   : > { %v1568_v43 = vpop.permute.xlu0 %1567  ;;  %v1914_v7 = vmul.f32 %v4656_v10, %v1909_v36  ;;  %v1130_v55 = vsel %vm3957_vm9, %v1122_v25, %v1129_v4  ;;  %v1147_v36 = vor.u32 %v1145_v18, %v1144_v32 }
 0x168   : > { %1316 = vrot.lane.b32.xlu1 %v4592_v62, %s3748_s10  ;;  %v1138_v62 = vor.u32 %v1136_v19, %v4727_v15  ;;  %1218 = vst.msk [vmem:[#allocation2 + $0x8c] sm:$0xf] %vm1183_vm1, %v1130_v55 }
 0x169   : > { %v4738_v16 = vpack.c.bf16 %v1914_v7, %v1914_v7  ;;  %1607 = vrot.lane.b32.xlu2 %v1535_v26, %s3749_s19  ;;  %v1927_v26 = vor.u32 %v1925_v13, %v1924_v50 }
 0x16a   : > { %v1275_v49 = vpop.permute.xlu1 %1274  ;;  %v1139_v19 = vsel %vm3957_vm9, %v1131_v14, %v1138_v62 }
 0x16b   : > { %1363 = vst.msk [vmem:[#allocation2 + $0x38] sm:$0xf] %vm1354_vm11, %v1275_v49  ;;  %v1576_v30 = vpop.permute.xlu2 %1575  ;;  %v1933_v27 = vshll.u32 %v4738_v16, 16  ;;  %v1915_v49 = vmul.f32 %v4656_v10, %v1910_v37 }
 0x16c   : > { %1663 = vst.msk [vmem:[#allocation2 + $0x38] sm:$0xf] %vm1654_vm15, %v1568_v43  ;;  %v3621_v24 = vld [vmem:[#allocation2 + $0x10] sm:$0xff]  ;;  %v1907_v43 = vadd.f32 %v4459_v45, %v1901_v2 }
 0x16d   : > { %2009 = vrot.lane.b32.xlu0 %v1990_v34, %s3749_s19  ;;  %3478 = vmatmul.msk.bf16.gmra.mxu1 %vm2159_vm5, %v3621_v24  ;;  %1219 = vst.msk [vmem:[#allocation2 + $0x90] sm:$0xf] %vm1183_vm1, %v1139_v19  ;;  %v4766_v20 = vrot.slane %v1933_v27, 5  ;;  %v1140_v34 = vrot.slane %v4727_v15, 4  ;;  %v1919_v24 = vpack.c.bf16 %v1915_v49, %v1915_v49  ;;  %v1967_v49 = vld [vmem:[#allocation2 + $0xa8] sm:$0x1] }
 0x16e   : > { %v1911_v0 = vmax.f32 %v1907_v43, 0.0 }
 0x16f   : > { %v1281_v31 = vpop.permute.xlu0 %1280  ;;  %v1148_v18 = vsel %vm3957_vm9, %v1140_v34, %v1147_v36  ;;  %v1939_v33 = vshrl.u32 %v1919_v24, 16  ;;  %v1942_v15 = vshll.u32 %v1919_v24, 16 }
 0x170   : > { %1366 = vst.msk [vmem:[#allocation2 + $0x44] sm:$0xf] %vm1354_vm11, %v1281_v31  ;;  %1613 = vrot.lane.b32.xlu1 %v1548_v59, %s3749_s19  ;;  %v1916_v45 = vmul.f32 %v4656_v10, %v1911_v0  ;;  %v1223_v10 = vld [vmem:[#allocation2 + $0x98] sm:$0x1] }
 0x171   : > { %1666 = vst.msk [vmem:[#allocation2 + $0x44] sm:$0xf] %vm1654_vm15, %v1574_v54  ;;  %v1993_v54 = vrot.slane %v1992_v11, 4  ;;  %1318 = vrot.lane.b32.xlu2 %v4627_v56, %s3748_s10  ;;  %v1999_v39 = vrot.slane %v1942_v15, 5  ;;  %v2001_v62 = vrot.slane %v1939_v33, 4 }
 0x172   : > { %v1570_v3 = vpop.permute.xlu1 %1569  ;;  %v4798_v44 = vpack.c.bf16 %v1916_v45, %v1916_v45  ;;  %1220 = vst.msk [vmem:[#allocation2 + $0x94] sm:$0xf] %vm1183_vm1, %v1148_v18 }
 0x173   : > { %1664 = vst.msk [vmem:[#allocation2 + $0x3c] sm:$0xf] %vm1654_vm15, %v1570_v3  ;;  %v1289_v41 = vpop.permute.xlu2 %1288  ;;  %v1995_v56 = vsel %vm3946_vm8, %v1993_v54, %v4766_v20  ;;  %v1928_v54 = vrot.slane %v1924_v50, 4 }
 0x174   : > { %1370 = vst.msk [vmem:[#allocation2 + $0x54] sm:$0xf] %vm1354_vm11, %v1289_v41  ;;  %v1951_v22 = vshll.u32 %v4798_v44, 16  ;;  %v2002_v41 = vor.u32 %v2001_v62, %v1999_v39 }
 0x175   : > { %1976 = vrot.lane.b32.xlu0 %v4738_v16, %s3748_s10 }
 0x176   : > { %v2003_v55 = vrot.slane %v2002_v41, 4 }
 0x177   : > { %v1283_v46 = vpop.permute.xlu0 %1282 }
 0x178   : > { %1367 = vst.msk [vmem:[#allocation2 + $0x48] sm:$0xf] %vm1354_vm11, %v1283_v46  ;;  %1611 = vrot.lane.b32.xlu1 %v1545_v47, %s3749_s19 }
 0x179   : > { %1667 = vst.msk [vmem:[#allocation2 + $0x48] sm:$0xf] %vm1654_vm15, %v1576_v30  ;;  %1974 = vrot.lane.b32.xlu2 %v4697_v63, %s3748_s10  ;;  %v1930_v63 = vshrl.u32 %v4738_v16, 16 }
 0x17a   : > { %v1572_v29 = vpop.permute.xlu1 %1571  ;;  %v4770_v35 = vld [vmem:[#allocation2 + $0x38] sm:$0xff] }
 0x17b   : > { %v3642_v21 = vld [vmem:[#allocation2 + $0x38] sm:$0xff]  ;;  %1665 = vst.msk [vmem:[#allocation2 + $0x40] sm:$0xf] %vm1654_vm15, %v1572_v29  ;;  %v1291_v52 = vpop.permute.xlu2 %1290  ;;  %3453 = vmatmul.msk.bf16.gmra.mxu3 %vm2159_vm5, %v4770_v35  ;;  %v1932_v14 = vrot.slane %v1930_v63, 7  ;;  %v1996_v38 = vrot.slane %v1930_v63, 4 }
 0x17c   : > { %3565 = vmatmul.msk.bf16.gmra.mxu2 %vm2159_vm5, %v3642_v21  ;;  %1371 = vst.msk [vmem:[#allocation2 + $0x58] sm:$0xf] %vm1354_vm11, %v1291_v52 }
 0x17d   : > { %3479 = vmatmul.msk.bf16.gmra.mxu1 %vm2159_vm5, %v4473_v17  ;;  %v1149_v17 = vrot.slane %v1144_v32, 4  ;;  %1980 = vrot.lane.b32.xlu0 %v4798_v44, %s3748_s10  ;;  %v1997_v19 = vor.u32 %v1996_v38, %v4766_v20  ;;  %v1935_v29 = vor.u32 %v1933_v27, %v1932_v14  ;;  %v1937_v52 = vrot.slane %v1932_v14, 4 }
 0x17f   : > { %v1578_v61 = vpop.permute.xlu0 %1577  ;;  %v1224_v59 = vsel %vm4413_vm2, %v1149_v17, %v1223_v10  ;;  %v1998_v51 = vrot.slane %v1997_v19, 4  ;;  %v1936_v37 = vsel %vm3957_vm9, %v1928_v54, %v1935_v29 }
 0x180   : > { %2011 = vrot.lane.b32.xlu1 %v1995_v56, %s3749_s19  ;;  %1225 = vst [vmem:[#allocation2 + $0x98] sm:$0x1] %v1224_v59 }
 0x181   : > { %v2000_v21 = vsel %vm3946_vm8, %v1998_v51, %v1999_v39  ;;  %1964 = vst.msk [vmem:[#allocation2 + $0x9c] sm:$0xf] %vm1183_vm1, %v1936_v37  ;;  %v4927_v51 = vld [vmem:[%s5183_s7] ss:$0 sm:$0xff] }
 0x182   : > { %v1285_v30 = vpop.permute.xlu1 %1284  ;;  %v4810_v31 = vld [vmem:[#allocation2 + $0x40] sm:$0xff]  ;;  %2013 = vrot.lane.b32.xlu2 %v2000_v21, %s3749_s19 }
 0x183   : > { %1368 = vst.msk [vmem:[#allocation2 + $0x4c] sm:$0xf] %vm1354_vm11, %v1285_v30  ;;  %v1586_v48 = vpop.permute.xlu2 %1585  ;;  %v3643_v4 = vld [vmem:[#allocation2 + $0x40] sm:$0xff] }
 0x184   : > { %1668 = vst.msk [vmem:[#allocation2 + $0x4c] sm:$0xf] %vm1654_vm15, %v1578_v61  ;;  %v1948_v61 = vshrl.u32 %v4798_v44, 16 }
 0x186   : > { %v1950_v0 = vrot.slane %v1948_v61, 7  ;;  %v2006_v28 = vrot.slane %v1948_v61, 4 }
 0x187   : > { %v1580_v7 = vpop.permute.xlu0 %1579  ;;  %v1961_v3 = vld [vmem:[#allocation2 + $0x98] sm:$0xf] }
 0x188   : > { %1978 = vrot.lane.b32.xlu1 %v1919_v24, %s3748_s10  ;;  %v1962_v25 = vsel %vm3918_vm3, %v1927_v26, %v1961_v3  ;;  %v1955_v45 = vrot.slane %v1950_v0, 4  ;;  %v1953_v59 = vor.u32 %v1951_v22, %v1950_v0  ;;  %vm3065_vm3 = vcmask 125952  }
 0x189   : > { %1963 = vst [vmem:[#allocation2 + $0x98] sm:$0xf] %v1962_v25 }
 0x18a   : > { %v1287_v9 = vpop.permute.xlu1 %1286 }
 0x18b   : > { %1369 = vst.msk [vmem:[#allocation2 + $0x50] sm:$0xf] %vm1354_vm11, %v1287_v9  ;;  %v1588_v23 = vpop.permute.xlu2 %1587  ;;  %3454 = vmatmul.msk.bf16.gmra.mxu3 %vm2159_vm5, %v4810_v31  ;;  %v4845_v20 = vld [vmem:[#allocation2 + $0x48] sm:$0xff] }
 0x18c   : > { %1669 = vst.msk [vmem:[#allocation2 + $0x50] sm:$0xf] %vm1654_vm15, %v1580_v7  ;;  %3566 = vmatmul.msk.bf16.gmra.mxu2 %vm2159_vm5, %v3643_v4  ;;  %v3644_v56 = vld [vmem:[#allocation2 + $0x48] sm:$0xff] }
 0x18d   : > { %3480 = vmatmul.msk.bf16.gmra.mxu1 %vm2159_vm5, %v4529_v42  ;;  %v2004_v42 = vrot.slane %v1951_v22, 5 }
 0x18f   : > { %v1293_v13 = vpop.permute.xlu0 %1292  ;;  %v2005_v11 = vsel %vm3946_vm8, %v2003_v55, %v2004_v42  ;;  %v2007_v17 = vor.u32 %v2006_v28, %v2004_v42 }
 0x190   : > { %1372 = vst.msk [vmem:[#allocation2 + $0x5c] sm:$0xf] %vm1354_vm11, %v1293_v13  ;;  %1841 = vrot.lane.b32.xlu1 %v4173_v57, %s3749_s19  ;;  %v1941_v57 = vrot.slane %v1939_v33, 7  ;;  %2015 = vrot.lane.b32.xlu0 %v2005_v11, %s3749_s19 }
 0x191   : > { %1672 = vst.msk [vmem:[#allocation2 + $0x5c] sm:$0xf] %vm1654_vm15, %v1586_v48  ;;  %v2008_v24 = vrot.slane %v2007_v17, 4 }
 0x192   : > { %v1582_v6 = vpop.permute.xlu1 %1581  ;;  %v1944_v32 = vor.u32 %v1942_v15, %v1941_v57  ;;  %v1946_v10 = vrot.slane %v1941_v57, 4 }
 0x193   : > { %1670 = vst.msk [vmem:[#allocation2 + $0x54] sm:$0xf] %vm1654_vm15, %v1582_v6  ;;  %v1301_v47 = vpop.permute.xlu2 %1300  ;;  %2017 = vrot.lane.b32.xlu2 %v2008_v24, %s3749_s19 }
 0x194   : > { %1376 = vst.msk [vmem:[#allocation2 + $0x6c] sm:$0xf] %vm1354_vm11, %v1301_v47  ;;  %v1945_v1 = vsel %vm3957_vm9, %v1937_v52, %v1944_v32  ;;  %v1954_v5 = vsel %vm3957_vm9, %v1946_v10, %v1953_v59 }
 0x195   : > { %1965 = vst.msk [vmem:[#allocation2 + $0xa0] sm:$0xf] %vm1183_vm1, %v1945_v1 }
 0x196   : > { %1966 = vst.msk [vmem:[#allocation2 + $0xa4] sm:$0xf] %vm1183_vm1, %v1954_v5  ;;  %vm2795_vm1 = vcmask 31744  }
 0x197   : > { %v1295_v46 = vpop.permute.xlu0 %1294 }
 0x198   : > { %1373 = vst.msk [vmem:[#allocation2 + $0x60] sm:$0xf] %vm1354_vm11, %v1295_v46 }
 0x199   : > { %1673 = vst.msk [vmem:[#allocation2 + $0x60] sm:$0xf] %vm1654_vm15, %v1588_v23 }
 0x19a   : > { %v1584_v2 = vpop.permute.xlu1 %1583  ;;  %v4862_v34 = vld [vmem:[#allocation2 + $0x50] sm:$0xff] }
 0x19b   : > { %1671 = vst.msk [vmem:[#allocation2 + $0x58] sm:$0xf] %vm1654_vm15, %v1584_v2  ;;  %v1303_v16 = vpop.permute.xlu2 %1302  ;;  %3455 = vmatmul.msk.bf16.gmra.mxu3 %vm2159_vm5, %v4845_v20  ;;  %v3645_v48 = vld [vmem:[#allocation2 + $0x50] sm:$0xff] }
 0x19c   : > { %3567 = vmatmul.msk.bf16.gmra.mxu2 %vm2159_vm5, %v3644_v56  ;;  %1377 = vst.msk [vmem:[#allocation2 + $0x70] sm:$0xf] %vm1354_vm11, %v1303_v16 }
 0x19d   : > { %3481 = vmatmul.msk.bf16.gmra.mxu1 %vm2159_vm5, %v4583_v12  ;;  %v1968_v12 = vsel %vm4413_vm2, %v1955_v45, %v1967_v49 }
 0x19e   : > { %1969 = vst [vmem:[#allocation2 + $0xa8] sm:$0x1] %v1968_v12 }
 0x19f   : > { %v1590_v27 = vpop.permute.xlu0 %1589 }
 0x1a2   : > { %v1297_v43 = vpop.permute.xlu1 %1296  ;;  %v4885_v9 = vld [vmem:[#allocation2 + $0x58] sm:$0xff] }
 0x1a3   : > { %1374 = vst.msk [vmem:[#allocation2 + $0x64] sm:$0xf] %vm1354_vm11, %v1297_v43  ;;  %v1598_v60 = vpop.permute.xlu2 %1597  ;;  %v3646_v4 = vld [vmem:[#allocation2 + $0x58] sm:$0xff] }
 0x1a4   : > { %1674 = vst.msk [vmem:[#allocation2 + $0x64] sm:$0xf] %vm1654_vm15, %v1590_v27 }
 0x1a7   : > { %v1592_v36 = vpop.permute.xlu0 %1591 }
 0x1aa   : > { %v1299_v30 = vpop.permute.xlu1 %1298 }
 0x1ab   : > { %1375 = vst.msk [vmem:[#allocation2 + $0x68] sm:$0xf] %vm1354_vm11, %v1299_v30  ;;  %v1600_v18 = vpop.permute.xlu2 %1599  ;;  %3456 = vmatmul.msk.bf16.gmra.mxu3 %vm2159_vm5, %v4862_v34  ;;  %v4898_v63 = vld [vmem:[#allocation2 + $0x60] sm:$0xff] }
 0x1ac   : > { %1675 = vst.msk [vmem:[#allocation2 + $0x68] sm:$0xf] %vm1654_vm15, %v1592_v36  ;;  %3568 = vmatmul.msk.bf16.gmra.mxu2 %vm2159_vm5, %v3645_v48  ;;  %v3647_v13 = vld [vmem:[#allocation2 + $0x60] sm:$0xff] }
 0x1ad   : > { %3482 = vmatmul.msk.bf16.gmra.mxu1 %vm2159_vm5, %v4669_v40 }
 0x1af   : > { %v1305_v44 = vpop.permute.xlu0 %1304 }
 0x1b0   : > { %1378 = vst.msk [vmem:[#allocation2 + $0x74] sm:$0xf] %vm1354_vm11, %v1305_v44 }
 0x1b1   : > { %1678 = vst.msk [vmem:[#allocation2 + $0x74] sm:$0xf] %vm1654_vm15, %v1598_v60  ;;  %v2221_v7 = vpop.f32.mrf.mxu3 }
 0x1b2   : > { %v1594_v50 = vpop.permute.xlu1 %1593 }
 0x1b3   : > { %1676 = vst.msk [vmem:[#allocation2 + $0x6c] sm:$0xf] %vm1654_vm15, %v1594_v50  ;;  %v1313_v33 = vpop.permute.xlu2 %1312 }
 0x1b4   : > { %1382 = vst.msk [vmem:[#allocation2 + $0x84] sm:$0xf] %vm1354_vm11, %v1313_v33 }
 0x1b7   : > { %v1307_v15 = vpop.permute.xlu0 %1306 }
 0x1b8   : > { %1379 = vst.msk [vmem:[#allocation2 + $0x78] sm:$0xf] %vm1354_vm11, %v1307_v15 }
 0x1b9   : > { %1679 = vst.msk [vmem:[#allocation2 + $0x78] sm:$0xf] %vm1654_vm15, %v1600_v18  ;;  %v2223_v40 = vpop.f32.mrf.mxu3 }
 0x1ba   : > { %v1596_v8 = vpop.permute.xlu1 %1595  ;;  %v4915_v57 = vld [vmem:[#allocation2 + $0x68] sm:$0xff] }
 0x1bb   : > { %1677 = vst.msk [vmem:[#allocation2 + $0x70] sm:$0xf] %vm1654_vm15, %v1596_v8  ;;  %3457 = vmatmul.msk.bf16.gmra.mxu3 %vm2159_vm5, %v4885_v9  ;;  %v1321_v23 = vpop.permute.xlu2 %1320 }
 0x1bc   : > { %3569 = vmatmul.msk.bf16.gmra.mxu2 %vm2159_vm5, %v3646_v4  ;;  %1386 = vst.msk [vmem:[#allocation2 + $0x94] sm:$0xf] %vm1354_vm11, %v1321_v23 }
 0x1bd   : > { %3483 = vmatmul.msk.bf16.gmra.mxu1 %vm2159_vm5, %v4770_v35 }
 0x1bf   : > { %v1602_v26 = vpop.permute.xlu0 %1601 }
 0x1c1   : > { %v4895_v39 = vpop.f32.mrf.mxu3 }
 0x1c2   : > { %v1309_v22 = vpop.permute.xlu1 %1308  ;;  %v4936_v0 = vld [vmem:[#allocation2 + $0x70] sm:$0xff] }
 0x1c3   : > { %1380 = vst.msk [vmem:[#allocation2 + $0x7c] sm:$0xf] %vm1354_vm11, %v1309_v22  ;;  %v1608_v25 = vpop.permute.xlu2 %1607  ;;  %v1688_v54 = vld [vmem:[#allocation2 + $0x94] sm:$0xf] }
 0x1c4   : > { %1680 = vst.msk [vmem:[#allocation2 + $0x7c] sm:$0xf] %vm1654_vm15, %v1602_v26  ;;  %v3649_v28 = vld [vmem:[#allocation2 + $0x70] sm:$0xff] }
 0x1c7   : > { %v1604_v62 = vpop.permute.xlu0 %1603 }
 0x1c9   : > { %v4905_v35 = vpop.f32.mrf.mxu3 }
 0x1ca   : > { %v1311_v3 = vpop.permute.xlu1 %1310 }
 0x1cb   : > { %1381 = vst.msk [vmem:[#allocation2 + $0x80] sm:$0xf] %vm1354_vm11, %v1311_v3  ;;  %3458 = vmatmul.msk.bf16.gmra.mxu3 %vm2159_vm5, %v4898_v63  ;;  %v1319_v6 = vpop.permute.xlu2 %1318  ;;  %v4956_v4 = vld [vmem:[#allocation2 + $0x78] sm:$0xff] }
 0x1cc   : > { %3570 = vmatmul.msk.bf16.gmra.mxu2 %vm2159_vm5, %v3647_v13  ;;  %1681 = vst.msk [vmem:[#allocation2 + $0x80] sm:$0xf] %vm1654_vm15, %v1604_v62  ;;  %v3650_v26 = vld [vmem:[#allocation2 + $0x78] sm:$0xff] }
 0x1cd   : > { %3484 = vmatmul.msk.bf16.gmra.mxu1 %vm2159_vm5, %v4810_v31  ;;  %1385 = vst.msk [vmem:[#allocation2 + $0x90] sm:$0xf] %vm1354_vm11, %v1319_v6  ;;  %v3648_v31 = vld [vmem:[#allocation2 + $0x68] sm:$0xff] }
 0x1ce   : > { %v2594_v55 = vpop.f32.mrf.mxu2 }
 0x1cf   : > { %v1315_v41 = vpop.permute.xlu0 %1314 }
 0x1d0   : > { %1383 = vst.msk [vmem:[#allocation2 + $0x88] sm:$0xf] %vm1354_vm11, %v1315_v41 }
 0x1d1   : > { %1683 = vst.msk [vmem:[#allocation2 + $0x88] sm:$0xf] %vm1654_vm15, %v1608_v25  ;;  %v4913_v14 = vpop.f32.mrf.mxu3  ;;  %v1856_v25 = vld [vmem:[#allocation2 + $0x4] sm:$0x8] }
 0x1d2   : > { %v1606_v42 = vpop.permute.xlu1 %1605 }
 0x1d3   : > { %1682 = vst.msk [vmem:[#allocation2 + $0x84] sm:$0xf] %vm1654_vm15, %v1606_v42  ;;  %v1975_v1 = vpop.permute.xlu2 %1974 }
 0x1d4   : > { %1986 = vst.msk [vmem:[#allocation2 + $0x98] sm:$0xf] %vm1354_vm11, %v1975_v1 }
 0x1d6   : > { %v2596_v32 = vpop.f32.mrf.mxu2 }
 0x1d7   : > { %v1610_v38 = vpop.permute.xlu0 %1609 }
 0x1d8   : > { %v2334_v47 = vpop.f32.mrf.mxu1 }
 0x1d9   : > { %v2335_v19 = vadd.f32 %v2334_v47, %v2221_v7  ;;  %v4929_v37 = vpop.f32.mrf.mxu3 }
 0x1da   : > { %v1317_v11 = vpop.permute.xlu1 %1316 }
 0x1db   : > { %1384 = vst.msk [vmem:[#allocation2 + $0x8c] sm:$0xf] %vm1354_vm11, %v1317_v11  ;;  %3459 = vmatmul.msk.bf16.gmra.mxu3 %vm2159_vm5, %v4915_v57  ;;  %v2674_v46 = vadd.f32 %v2594_v55, %v2335_v19 }
 0x1dc   : > { %3571 = vmatmul.msk.bf16.gmra.mxu2 %vm2159_vm5, %v3648_v31  ;;  %1684 = vst.msk [vmem:[#allocation2 + $0x8c] sm:$0xf] %vm1654_vm15, %v1610_v38  ;;  %v2014_v44 = vpop.permute.xlu2 %2013 }
 0x1dd   : > { %3485 = vmatmul.msk.bf16.gmra.mxu1 %vm2159_vm5, %v4845_v20  ;;  %v2710_v56 = vadd.f32 %v4927_v51, %v2674_v46 }
 0x1df   : > { %v2010_v20 = vpop.permute.xlu0 %2009  ;;  %v2742_v43 = vmax.f32 %v2710_v56, 0.0 }
 0x1e0   : > { %v2336_v29 = vpop.f32.mrf.mxu1 }
 0x1e1   : > { %v2337_v21 = vadd.f32 %v2336_v29, %v2223_v40  ;;  %v4975_v29 = vld [vmem:[#allocation2 + $0x80] sm:$0xff] }
 0x1e2   : > { %v1614_v52 = vpop.permute.xlu1 %1613 }
 0x1e3   : > { %v1689_v2 = vsel %vm4676_vm6, %v1614_v52, %v1688_v54  ;;  %v2675_v16 = vadd.f32 %v2596_v32, %v2337_v21  ;;  %v4944_v48 = vpop.f32.mrf.mxu3  ;;  %v3651_v21 = vld [vmem:[#allocation2 + $0x80] sm:$0xff] }
 0x1e4   : > { %1690 = vst [vmem:[#allocation2 + $0x94] sm:$0xf] %v1689_v2  ;;  %v2599_v49 = vpop.f32.mrf.mxu2 }
 0x1e5   : > { %v2711_v27 = vadd.f32 %v4927_v51, %v2675_v16 }
 0x1e7   : > { %v2743_v60 = vmax.f32 %v2711_v27, 0.0  ;;  %v1977_v12 = vpop.permute.xlu0 %1976 }
 0x1e8   : > { %1987 = vst.msk [vmem:[#allocation2 + $0x9c] sm:$0xf] %vm1354_vm11, %v1977_v12 }
 0x1e9   : > { %v2774_v36 = vpack.c.bf16 %v2743_v60, %v2742_v43  ;;  %2028 = vst.msk [vmem:[#allocation2 + $0x9c] sm:$0xf] %vm1654_vm15, %v2014_v44 }
 0x1ea   : > { %v1612_v61 = vpop.permute.xlu1 %1611  ;;  %v2339_v45 = vpop.f32.mrf.mxu1 }
 0x1eb   : > { %1685 = vst.msk [vmem:[#allocation2 + $0x90] sm:$0xf] %vm1654_vm15, %v1612_v61  ;;  %v2024_v17 = vld [vmem:[#allocation2 + $0x94] sm:$0x8]  ;;  %3460 = vmatmul.msk.bf16.gmra.mxu3 %vm2159_vm5, %v4936_v0  ;;  %3579 = vmatmul.msk.bf16.vlgmr.msrb.gmra.mxu0 %vm2795_vm1, %v2774_v36  ;;  %v2340_v24 = vadd.f32 %v2339_v45, %v4895_v39  ;;  %v2238_v15 = vpop.f32.mrf.mxu3  ;;  %v3652_v45 = vld [vmem:[#allocation2 + $0x88] sm:$0xff] }
 0x1ec   : > { %3572 = vmatmul.msk.bf16.gmra.mxu2 %vm2159_vm5, %v3649_v28  ;;  %v2025_v30 = vsel %vm4337_vm14, %v2010_v20, %v2024_v17  ;;  %v2601_v50 = vpop.f32.mrf.mxu2 }
 0x1ed   : > { %2026 = vst [vmem:[#allocation2 + $0x94] sm:$0x8] %v2025_v30  ;;  %3486 = vmatmul.msk.bf16.gmra.mxu1 %vm2159_vm5, %v4862_v34  ;;  %v2676_v18 = vadd.f32 %v2599_v49, %v2340_v24  ;;  %v2018_v46 = vpop.permute.xlu2 %2017  ;;  %v3637_v49 = vld [vmem:[#allocation2 + $0x88] sm:$0xff] }
 0x1ef   : > { %v2712_v7 = vadd.f32 %v4927_v51, %v2676_v18  ;;  %v1981_v62 = vpop.permute.xlu0 %1980 }
 0x1f0   : > { %1989 = vst.msk [vmem:[#allocation2 + $0xa4] sm:$0xf] %vm1354_vm11, %v1981_v62 }
 0x1f1   : > { %v2744_v34 = vmax.f32 %v2712_v7, 0.0 }
 0x1f2   : > { %v2012_v10 = vpop.permute.xlu1 %2011  ;;  %v2341_v59 = vpop.f32.mrf.mxu1 }
 0x1f3   : > { %2027 = vst.msk [vmem:[#allocation2 + $0x98] sm:$0xf] %vm1654_vm15, %v2012_v10  ;;  %v2342_v5 = vadd.f32 %v2341_v59, %v4905_v35 }
 0x1f5   : > { %v2677_v33 = vadd.f32 %v2601_v50, %v2342_v5 }
 0x1f7   : > { %v2713_v8 = vadd.f32 %v4927_v51, %v2677_v33  ;;  %v2030_v38 = vld [vmem:[#allocation2 + $0xa4] sm:$0xf] }
 0x1f9   : > { %v2745_v23 = vmax.f32 %v2713_v8, 0.0  ;;  %v3638_v8 = vld [vmem:[#allocation2 + $0x90] sm:$0xff] }
 0x1fa   : > { %v1979_v40 = vpop.permute.xlu1 %1978  ;;  %v2344_v22 = vpop.f32.mrf.mxu1 }
 0x1fb   : > { %1988 = vst.msk [vmem:[#allocation2 + $0xa0] sm:$0xf] %vm1354_vm11, %v1979_v40  ;;  %3461 = vmatmul.msk.bf16.gmra.mxu3 %vm2159_vm5, %v4956_v4  ;;  %v2775_v39 = vpack.c.bf16 %v2745_v23, %v2744_v34  ;;  %v2345_v35 = vadd.f32 %v2344_v22, %v4913_v14  ;;  %v2031_v14 = vsel %vm4676_vm6, %v2018_v46, %v2030_v38  ;;  %v3653_v34 = vld [vmem:[#allocation2 + $0x90] sm:$0xff] }
 0x1fc   : > { %3573 = vmatmul.msk.bf16.gmra.mxu2 %vm2159_vm5, %v3650_v26  ;;  %2032 = vst [vmem:[#allocation2 + $0xa4] sm:$0xf] %v2031_v14 }
 0x1fd   : > { %3487 = vmatmul.msk.bf16.gmra.mxu1 %vm2159_vm5, %v4885_v9  ;;  %3580 = vmatmul.msk.bf16.gmra.mxu0 %vm2795_vm1, %v2775_v39 }
 0x1fe   : > { %v2241_v3 = vpop.f32.mrf.mxu3 }
 0x1ff   : > { %v2604_v13 = vpop.f32.mrf.mxu2 }
 0x200   : > { %v2678_v55 = vadd.f32 %v2604_v13, %v2345_v35 }
 0x202   : > { %v1842_v41 = vpop.permute.xlu1 %1841  ;;  %v2346_v6 = vpop.f32.mrf.mxu1  ;;  %v2714_v9 = vadd.f32 %v4927_v51, %v2678_v55 }
 0x203   : > { %v1857_v42 = vsel %vm4337_vm14, %v1842_v41, %v1856_v25  ;;  %v2347_v47 = vadd.f32 %v2346_v6, %v4929_v37  ;;  %v2016_v54 = vpop.permute.xlu0 %2015 }
 0x204   : > { %1858 = vst [vmem:[#allocation2 + $0x4] sm:$0x8] %v1857_v42  ;;  %v2746_v32 = vmax.f32 %v2714_v9, 0.0 }
 0x205   : > { %2029 = vst.msk [vmem:[#allocation2 + $0xa0] sm:$0xf] %vm1654_vm15, %v2016_v54 }
 0x206   : > { %v2243_v11 = vpop.f32.mrf.mxu3 }
 0x207   : > { %v2606_v31 = vpop.f32.mrf.mxu2 }
 0x208   : > { %v2679_v19 = vadd.f32 %v2606_v31, %v2347_v47  ;;  %v3654_v47 = vld [vmem:[#allocation2 + $0x98] sm:$0xff] }
 0x20a   : > { %v2715_v53 = vadd.f32 %v4927_v51, %v2679_v19  ;;  %v2349_v52 = vpop.f32.mrf.mxu1 }
 0x20b   : > { %3462 = vmatmul.msk.bf16.gmra.mxu3 %vm2159_vm5, %v4975_v29  ;;  %v2350_v16 = vadd.f32 %v2349_v52, %v4944_v48 }
 0x20c   : > { %v2747_v37 = vmax.f32 %v2715_v53, 0.0  ;;  %3574 = vmatmul.msk.bf16.gmra.mxu2 %vm2159_vm5, %v3651_v21 }
 0x20d   : > { %3488 = vmatmul.msk.bf16.gmra.mxu1 %vm2159_vm5, %v4898_v63 }
 0x20e   : > { %v2776_v58 = vpack.c.bf16 %v2747_v37, %v2746_v32  ;;  %v2246_v2 = vpop.f32.mrf.mxu3 }
 0x20f   : > { %v2609_v56 = vpop.f32.mrf.mxu2 }
 0x210   : > { %3581 = vmatmul.msk.bf16.gmra.mxu0 %vm2795_vm1, %v2776_v58  ;;  %v2680_v1 = vadd.f32 %v2609_v56, %v2350_v16 }
 0x212   : > { %v2351_v20 = vpop.f32.mrf.mxu1  ;;  %v2716_v61 = vadd.f32 %v4927_v51, %v2680_v1 }
 0x213   : > { %v2352_v27 = vadd.f32 %v2351_v20, %v2238_v15 }
 0x214   : > { %v2748_v17 = vmax.f32 %v2716_v61, 0.0 }
 0x216   : > { %v2248_v43 = vpop.f32.mrf.mxu3 }
 0x217   : > { %v2611_v60 = vpop.f32.mrf.mxu2 }
 0x218   : > { %v2681_v28 = vadd.f32 %v2611_v60, %v2352_v27 }
 0x21a   : > { %v2717_v36 = vadd.f32 %v4927_v51, %v2681_v28  ;;  %v2354_v63 = vpop.f32.mrf.mxu1 }
 0x21b   : > { %3463 = vmatmul.msk.bf16.gmra.mxu3 %vm2159_vm5, %v3637_v49  ;;  %v2355_v18 = vadd.f32 %v2354_v63, %v2241_v3 }
 0x21c   : > { %v2749_v30 = vmax.f32 %v2717_v36, 0.0  ;;  %3575 = vmatmul.msk.bf16.gmra.mxu2 %vm2159_vm5, %v3652_v45 }
 0x21d   : > { %3489 = vmatmul.msk.bf16.gmra.mxu1 %vm2159_vm5, %v4915_v57 }
 0x21e   : > { %v2777_v48 = vpack.c.bf16 %v2749_v30, %v2748_v17  ;;  %v2251_v12 = vpop.f32.mrf.mxu3 }
 0x21f   : > { %v2614_v24 = vpop.f32.mrf.mxu2 }
 0x220   : > { %3582 = vmatmul.msk.bf16.gmra.mxu0 %vm2795_vm1, %v2777_v48  ;;  %v2682_v59 = vadd.f32 %v2614_v24, %v2355_v18 }
 0x222   : > { %v2356_v10 = vpop.f32.mrf.mxu1  ;;  %v2718_v7 = vadd.f32 %v4927_v51, %v2682_v59 }
 0x223   : > { %v2357_v5 = vadd.f32 %v2356_v10, %v2243_v11 }
 0x224   : > { %v2750_v57 = vmax.f32 %v2718_v7, 0.0 }
 0x226   : > { %v2253_v44 = vpop.f32.mrf.mxu3 }
 0x227   : > { %v2616_v50 = vpop.f32.mrf.mxu2 }
 0x228   : > { %v2683_v33 = vadd.f32 %v2616_v50, %v2357_v5  ;;  %v508_v50 = vld [vmem:[%s3851_s26] sm:$0xff]  }
 0x22a   : > { %v2719_v15 = vadd.f32 %v4927_v51, %v2683_v33  ;;  %v2359_v40 = vpop.f32.mrf.mxu1  ;;  %v5017_v33 = vld [vmem:[%s5184_s8] ss:$0 sm:$0xff] }
 0x22b   : > { %3464 = vmatmul.msk.bf16.gmra.mxu3 %vm2159_vm5, %v3638_v8  ;;  %v2360_v62 = vadd.f32 %v2359_v40, %v2246_v2  ;;  %v3655_v2 = vld [vmem:[#allocation2 + $0xa0] sm:$0xff] }
 0x22c   : > { %v2751_v26 = vmax.f32 %v2719_v15, 0.0  ;;  %3576 = vmatmul.msk.bf16.gmra.mxu2 %vm2159_vm5, %v3653_v34  ;;  %v2937_v34 = vunpack.c.l.bf16 %v508_v50 }
 0x22d   : > { %3490 = vmatmul.msk.bf16.gmra.mxu1 %vm2159_vm5, %v4936_v0 }
 0x22e   : > { %v2778_v23 = vpack.c.bf16 %v2751_v26, %v2750_v57  ;;  %v2256_v22 = vpop.f32.mrf.mxu3 }
 0x22f   : > { %v2619_v39 = vpop.f32.mrf.mxu2 }
 0x230   : > { %3583 = vmatmul.msk.bf16.gmra.mxu0 %vm2795_vm1, %v2778_v23  ;;  %v2684_v13 = vadd.f32 %v2619_v39, %v2360_v62 }
 0x232   : > { %v2361_v3 = vpop.f32.mrf.mxu1  ;;  %v2720_v42 = vadd.f32 %v4927_v51, %v2684_v13 }
 0x233   : > { %v2362_v25 = vadd.f32 %v2361_v3, %v2248_v43 }
 0x234   : > { %v2752_v11 = vmax.f32 %v2720_v42, 0.0  ;;  %v2938_v42 = vunpack.c.h.bf16 %v508_v50 }
 0x236   : > { %v2258_v35 = vpop.f32.mrf.mxu3 }
 0x237   : > { %v2621_v41 = vpop.f32.mrf.mxu2 }
 0x238   : > { %v2685_v6 = vadd.f32 %v2621_v41, %v2362_v25 }
 0x23a   : > { %v2721_v55 = vadd.f32 %v4927_v51, %v2685_v6  ;;  %v2364_v38 = vpop.f32.mrf.mxu1 }
 0x23b   : > { %v2365_v46 = vadd.f32 %v2364_v38, %v2251_v12 }
 0x23c   : > { %v2753_v0 = vmax.f32 %v2721_v55, 0.0  ;;  %3577 = vmatmul.msk.bf16.gmra.mxu2 %vm2159_vm5, %v3654_v47 }
 0x23d   : > { %3491 = vmatmul.msk.bf16.gmra.mxu1 %vm2159_vm5, %v4956_v4 }
 0x23e   : > { %v2779_v31 = vpack.c.bf16 %v2753_v0, %v2752_v11  ;;  %v2261_v9 = vpop.f32.mrf.mxu3 }
 0x23f   : > { %v2624_v19 = vpop.f32.mrf.mxu2 }
 0x240   : > { %3584 = vmatmul.msk.bf16.gmra.mxu0 %vm2795_vm1, %v2779_v31  ;;  %v2686_v14 = vadd.f32 %v2624_v19, %v2365_v46  ;;  %v510_v46 = vld [vmem:[%s3851_s26 + $0x8] sm:$0xff]  }
 0x242   : > { %v2366_v54 = vpop.f32.mrf.mxu1  ;;  %v2722_v52 = vadd.f32 %v4927_v51, %v2686_v14 }
 0x243   : > { %v2367_v53 = vadd.f32 %v2366_v54, %v2253_v44 }
 0x244   : > { %v2754_v16 = vmax.f32 %v2722_v52, 0.0 }
 0x246   : > { %v2263_v32 = vpop.f32.mrf.mxu3 }
 0x247   : > { %v2626_v21 = vpop.f32.mrf.mxu2 }
 0x248   : > { %v2687_v37 = vadd.f32 %v2626_v21, %v2367_v53 }
 0x24a   : > { %v2723_v58 = vadd.f32 %v4927_v51, %v2687_v37  ;;  %v2369_v56 = vpop.f32.mrf.mxu1 }
 0x24b   : > { %v2370_v27 = vadd.f32 %v2369_v56, %v2256_v22 }
 0x24c   : > { %v2755_v4 = vmax.f32 %v2723_v58, 0.0  ;;  %3578 = vmatmul.msk.bf16.gmra.mxu2 %vm2159_vm5, %v3655_v2 }
 0x24d   : > { %3492 = vmatmul.msk.bf16.gmra.mxu1 %vm2159_vm5, %v4975_v29 }
 0x24e   : > { %v2780_v20 = vpack.c.bf16 %v2755_v4, %v2754_v16  ;;  %v2266_v43 = vpop.f32.mrf.mxu3 }
 0x24f   : > { %v2629_v1 = vpop.f32.mrf.mxu2 }
 0x250   : > { %3585 = vmatmul.msk.bf16.gmra.mxu0 %vm2795_vm1, %v2780_v20  ;;  %v2688_v61 = vadd.f32 %v2629_v1, %v2370_v27 }
 0x252   : > { %v2371_v60 = vpop.f32.mrf.mxu1  ;;  %v2724_v49 = vadd.f32 %v4927_v51, %v2688_v61  ;;  %v2940_v61 = vunpack.c.h.bf16 %v510_v46 }
 0x253   : > { %v2372_v28 = vadd.f32 %v2371_v60, %v2258_v35 }
 0x254   : > { %v2756_v30 = vmax.f32 %v2724_v49, 0.0 }
 0x256   : > { %v2268_v48 = vpop.f32.mrf.mxu3 }
 0x257   : > { %v2631_v36 = vpop.f32.mrf.mxu2 }
 0x258   : > { %v2689_v45 = vadd.f32 %v2631_v36, %v2372_v28 }
 0x25a   : > { %v2725_v63 = vadd.f32 %v4927_v51, %v2689_v45  ;;  %v2374_v17 = vpop.f32.mrf.mxu1 }
 0x25b   : > { %v2375_v18 = vadd.f32 %v2374_v17, %v2261_v9 }
 0x25c   : > { %v2757_v29 = vmax.f32 %v2725_v63, 0.0 }
 0x25e   : > { %v2781_v12 = vpack.c.bf16 %v2757_v29, %v2756_v30  ;;  %v2271_v5 = vpop.f32.mrf.mxu3 }
 0x25f   : > { %v2634_v24 = vpop.f32.mrf.mxu2 }
 0x260   : > { %3586 = vmatmul.msk.bf16.gmra.mxu0 %vm2795_vm1, %v2781_v12  ;;  %v2690_v59 = vadd.f32 %v2634_v24, %v2375_v18  ;;  %v512_v18 = vld [vmem:[%s3851_s26 + $0x10] sm:$0xff]  }
 0x262   : > { %v2376_v10 = vpop.f32.mrf.mxu1  ;;  %v2726_v15 = vadd.f32 %v4927_v51, %v2690_v59 }
 0x263   : > { %v2377_v44 = vadd.f32 %v2376_v10, %v2263_v32  ;;  %v2939_v32 = vunpack.c.l.bf16 %v510_v46 }
 0x264   : > { %v2758_v22 = vmax.f32 %v2726_v15, 0.0 }
 0x266   : > { %v2273_v35 = vpop.f32.mrf.mxu3 }
 0x267   : > { %v2636_v7 = vpop.f32.mrf.mxu2 }
 0x268   : > { %v2691_v8 = vadd.f32 %v2636_v7, %v2377_v44  ;;  %v2857_v57 = vpop.f32.mrf.mxu0  ;;  %v2941_v7 = vunpack.c.l.bf16 %v512_v18 }
 0x269   : > { %v2858_v26 = vadd.f32 %v5017_v33, %v2857_v57 }
 0x26a   : > { %v2727_v40 = vadd.f32 %v4927_v51, %v2691_v8  ;;  %v2379_v23 = vpop.f32.mrf.mxu1 }
 0x26b   : > { %v2969_v62 = vadd.f32 %v2937_v34, %v2858_v26  ;;  %v2380_v6 = vadd.f32 %v2379_v23, %v2266_v43 }
 0x26c   : > { %v2759_v39 = vmax.f32 %v2727_v40, 0.0 }
 0x26d   : > { %v3001_v13 = vmax.f32 %v2969_v62, 0.0 }
 0x26e   : > { %v2782_v3 = vpack.c.bf16 %v2759_v39, %v2758_v22  ;;  %v2276_v21 = vpop.f32.mrf.mxu3 }
 0x26f   : > { %v2639_v25 = vpop.f32.mrf.mxu2  ;;  %v3033_v41 = vpack.c.bf16 %v3001_v13, %v3001_v13  ;;  %v2942_v13 = vunpack.c.h.bf16 %v512_v18 }
 0x270   : > { %3587 = vmatmul.msk.bf16.gmra.mxu0 %vm2795_vm1, %v2782_v3  ;;  %v2859_v55 = vpop.f32.mrf.mxu0  ;;  %v2692_v11 = vadd.f32 %v2639_v25, %v2380_v6 }
 0x271   : > { %3066 = vst.msk [vmem:[%s5027_s20] sm:$0xf] %vm3065_vm3, %v3033_v41  ;;  %v2860_v47 = vadd.f32 %v5017_v33, %v2859_v55 }
 0x272   : > { %v2381_v38 = vpop.f32.mrf.mxu1  ;;  %v2728_v54 = vadd.f32 %v4927_v51, %v2692_v11  ;;  %v514_v11 = vld [vmem:[%s3851_s26 + $0x18] sm:$0xff]  }
 0x273   : > { %v2970_v0 = vadd.f32 %v2938_v42, %v2860_v47  ;;  %v2382_v31 = vadd.f32 %v2381_v38, %v2268_v48 }
 0x274   : > { %v2760_v2 = vmax.f32 %v2728_v54, 0.0 }
 0x275   : > { %v3002_v9 = vmax.f32 %v2970_v0, 0.0 }
 0x276   : > { %v2278_v63 = vpop.f32.mrf.mxu3 }
 0x277   : > { %v2641_v19 = vpop.f32.mrf.mxu2  ;;  %v3034_v53 = vpack.c.bf16 %v3002_v9, %v3002_v9 }
 0x278   : > { %v2693_v14 = vadd.f32 %v2641_v19, %v2382_v31 }
 0x279   : > { %3067 = vst.msk [vmem:[%s5027_s20 + $0x4] sm:$0xf] %vm3065_vm3, %v3034_v53 }
 0x27a   : > { %v2729_v52 = vadd.f32 %v4927_v51, %v2693_v14  ;;  %v2384_v37 = vpop.f32.mrf.mxu1  ;;  %v2862_v58 = vpop.f32.mrf.mxu0  ;;  %v2943_v14 = vunpack.c.l.bf16 %v514_v11 }
 0x27b   : > { %v2863_v16 = vadd.f32 %v5017_v33, %v2862_v58  ;;  %v2385_v43 = vadd.f32 %v2384_v37, %v2271_v5 }
 0x27c   : > { %v2761_v56 = vmax.f32 %v2729_v52, 0.0 }
 0x27d   : > { %v2971_v20 = vadd.f32 %v2939_v32, %v2863_v16 }
 0x27e   : > { %v2783_v4 = vpack.c.bf16 %v2761_v56, %v2760_v2  ;;  %v2281_v40 = vpop.f32.mrf.mxu3 }
 0x27f   : > { %v2644_v1 = vpop.f32.mrf.mxu2  ;;  %v3003_v27 = vmax.f32 %v2971_v20, 0.0 }
 0x280   : > { %3588 = vmatmul.msk.bf16.gmra.mxu0 %vm2795_vm1, %v2783_v4  ;;  %v2694_v49 = vadd.f32 %v2644_v1, %v2385_v43  ;;  %v2944_v1 = vunpack.c.h.bf16 %v514_v11 }
 0x281   : > { %v3035_v60 = vpack.c.bf16 %v3003_v27, %v3003_v27 }
 0x282   : > { %v2386_v28 = vpop.f32.mrf.mxu1  ;;  %v2864_v36 = vpop.f32.mrf.mxu0  ;;  %v2730_v29 = vadd.f32 %v4927_v51, %v2694_v49 }
 0x283   : > { %3068 = vst.msk [vmem:[%s5027_s20 + $0x8] sm:$0xf] %vm3065_vm3, %v3035_v60  ;;  %v2865_v45 = vadd.f32 %v5017_v33, %v2864_v36  ;;  %v2387_v17 = vadd.f32 %v2386_v28, %v2273_v35 }
 0x284   : > { %v2762_v44 = vmax.f32 %v2730_v29, 0.0 }
 0x285   : > { %v2972_v30 = vadd.f32 %v2940_v61, %v2865_v45  ;;  %v516_v45 = vld [vmem:[%s3851_s26 + $0x20] sm:$0xff]  }
 0x286   : > { %v2283_v38 = vpop.f32.mrf.mxu3 }
 0x287   : > { %v2646_v48 = vpop.f32.mrf.mxu2  ;;  %v3004_v12 = vmax.f32 %v2972_v30, 0.0 }
 0x288   : > { %v2695_v24 = vadd.f32 %v2646_v48, %v2387_v17 }
 0x289   : > { %v3036_v10 = vpack.c.bf16 %v3004_v12, %v3004_v12 }
 0x28a   : > { %v2731_v59 = vadd.f32 %v4927_v51, %v2695_v24  ;;  %v2389_v5 = vpop.f32.mrf.mxu1  ;;  %v2945_v24 = vunpack.c.l.bf16 %v516_v45 }
 0x28b   : > { %3069 = vst.msk [vmem:[%s5027_s20 + $0xc] sm:$0xf] %vm3065_vm3, %v3036_v10  ;;  %v2390_v23 = vadd.f32 %v2389_v5, %v2276_v21 }
 0x28c   : > { %v2763_v50 = vmax.f32 %v2731_v59, 0.0 }
 0x28d   : > { %v2867_v15 = vpop.f32.mrf.mxu0 }
 0x28e   : > { %v2784_v8 = vpack.c.bf16 %v2763_v50, %v2762_v44  ;;  %v2868_v34 = vadd.f32 %v5017_v33, %v2867_v15  ;;  %v2286_v56 = vpop.f32.mrf.mxu3 }
 0x28f   : > { %v2649_v57 = vpop.f32.mrf.mxu2 }
 0x290   : > { %v2973_v26 = vadd.f32 %v2941_v7, %v2868_v34  ;;  %3589 = vmatmul.msk.bf16.gmra.mxu0 %vm2795_vm1, %v2784_v8  ;;  %v2696_v3 = vadd.f32 %v2649_v57, %v2390_v23  ;;  %v2946_v57 = vunpack.c.h.bf16 %v516_v45 }
 0x292   : > { %v3005_v22 = vmax.f32 %v2973_v26, 0.0  ;;  %v2391_v39 = vpop.f32.mrf.mxu1  ;;  %v2732_v6 = vadd.f32 %v4927_v51, %v2696_v3 }
 0x293   : > { %v2392_v35 = vadd.f32 %v2391_v39, %v2278_v63 }
 0x294   : > { %v3037_v62 = vpack.c.bf16 %v3005_v22, %v3005_v22  ;;  %v2764_v19 = vmax.f32 %v2732_v6, 0.0 }
 0x295   : > { %v2869_v25 = vpop.f32.mrf.mxu0 }
 0x296   : > { %3070 = vst.msk [vmem:[%s5027_s20 + $0x10] sm:$0xf] %vm3065_vm3, %v3037_v62  ;;  %v2870_v41 = vadd.f32 %v5017_v33, %v2869_v25  ;;  %v2288_v18 = vpop.f32.mrf.mxu3 }
 0x297   : > { %v2651_v42 = vpop.f32.mrf.mxu2 }
 0x298   : > { %v2974_v55 = vadd.f32 %v2942_v13, %v2870_v41  ;;  %v2697_v47 = vadd.f32 %v2651_v42, %v2392_v35  ;;  %v518_v35 = vld [vmem:[%s3851_s26 + $0x28] sm:$0xff]  }
 0x299   : > { %v2947_v11 = vunpack.c.l.bf16 %v518_v35 }
 0x29a   : > { %v3006_v0 = vmax.f32 %v2974_v55, 0.0  ;;  %v2733_v31 = vadd.f32 %v4927_v51, %v2697_v47  ;;  %v2394_v9 = vpop.f32.mrf.mxu1 }
 0x29b   : > { %v2395_v58 = vadd.f32 %v2394_v9, %v2281_v40 }
 0x29c   : > { %v3038_v46 = vpack.c.bf16 %v3006_v0, %v3006_v0  ;;  %v2765_v54 = vmax.f32 %v2733_v31, 0.0 }
 0x29d   : > { %v2872_v53 = vpop.f32.mrf.mxu0 }
 0x29e   : > { %3071 = vst.msk [vmem:[%s5027_s20 + $0x14] sm:$0xf] %vm3065_vm3, %v3038_v46  ;;  %v2785_v21 = vpack.c.bf16 %v2765_v54, %v2764_v19  ;;  %v2873_v52 = vadd.f32 %v5017_v33, %v2872_v53  ;;  %v2291_v39 = vpop.f32.mrf.mxu3 }
 0x29f   : > { %v2654_v32 = vpop.f32.mrf.mxu2 }
 0x2a0   : > { %v2975_v37 = vadd.f32 %v2943_v14, %v2873_v52  ;;  %3590 = vmatmul.msk.bf16.gmra.mxu0 %vm2795_vm1, %v2785_v21  ;;  %v2698_v20 = vadd.f32 %v2654_v32, %v2395_v58 }
 0x2a2   : > { %v3007_v2 = vmax.f32 %v2975_v37, 0.0  ;;  %v2396_v16 = vpop.f32.mrf.mxu1  ;;  %v2734_v28 = vadd.f32 %v4927_v51, %v2698_v20  ;;  %v2948_v37 = vunpack.c.h.bf16 %v518_v35 }
 0x2a3   : > { %v2397_v43 = vadd.f32 %v2396_v16, %v2283_v38 }
 0x2a4   : > { %v3039_v4 = vpack.c.bf16 %v3007_v2, %v3007_v2  ;;  %v2766_v48 = vmax.f32 %v2734_v28, 0.0 }
 0x2a5   : > { %v2874_v27 = vpop.f32.mrf.mxu0 }
 0x2a6   : > { %3072 = vst.msk [vmem:[%s5027_s20 + $0x18] sm:$0xf] %vm3065_vm3, %v3039_v4  ;;  %v2875_v60 = vadd.f32 %v5017_v33, %v2874_v27  ;;  %v2293_v54 = vpop.f32.mrf.mxu3  ;;  %v520_v27 = vld [vmem:[%s3851_s26 + $0x30] sm:$0xff]  }
 0x2a7   : > { %v2656_v61 = vpop.f32.mrf.mxu2 }
 0x2a8   : > { %v2976_v36 = vadd.f32 %v2944_v1, %v2875_v60  ;;  %v2699_v49 = vadd.f32 %v2656_v61, %v2397_v43 }
 0x2aa   : > { %v3008_v63 = vmax.f32 %v2976_v36, 0.0  ;;  %v2735_v17 = vadd.f32 %v4927_v51, %v2699_v49  ;;  %v2399_v30 = vpop.f32.mrf.mxu1 }
 0x2ab   : > { %v2400_v7 = vadd.f32 %v2399_v30, %v2286_v56 }
 0x2ac   : > { %v3040_v29 = vpack.c.bf16 %v3008_v63, %v3008_v63  ;;  %v2767_v12 = vmax.f32 %v2735_v17, 0.0  ;;  %v2949_v63 = vunpack.c.l.bf16 %v520_v27 }
 0x2ad   : > { %v2877_v10 = vpop.f32.mrf.mxu0 }
 0x2ae   : > { %3073 = vst.msk [vmem:[%s5027_s20 + $0x1c] sm:$0xf] %vm3065_vm3, %v3040_v29  ;;  %v2786_v59 = vpack.c.bf16 %v2767_v12, %v2766_v48  ;;  %v2878_v5 = vadd.f32 %v5017_v33, %v2877_v10  ;;  %v2296_v61 = vpop.f32.mrf.mxu3 }
 0x2af   : > { %v2659_v44 = vpop.f32.mrf.mxu2 }
 0x2b0   : > { %v2977_v50 = vadd.f32 %v2945_v24, %v2878_v5  ;;  %3591 = vmatmul.msk.bf16.gmra.mxu0 %vm2795_vm1, %v2786_v59  ;;  %v2700_v40 = vadd.f32 %v2659_v44, %v2400_v7  ;;  %v2950_v44 = vunpack.c.h.bf16 %v520_v27 }
 0x2b2   : > { %v3009_v15 = vmax.f32 %v2977_v50, 0.0  ;;  %v2401_v8 = vpop.f32.mrf.mxu1  ;;  %v2736_v3 = vadd.f32 %v4927_v51, %v2700_v40 }
 0x2b3   : > { %v2402_v23 = vadd.f32 %v2401_v8, %v2288_v18 }
 0x2b4   : > { %v3041_v34 = vpack.c.bf16 %v3009_v15, %v3009_v15  ;;  %v2768_v55 = vmax.f32 %v2736_v3, 0.0 }
 0x2b5   : > { %v2879_v26 = vpop.f32.mrf.mxu0 }
 0x2b6   : > { %3074 = vst.msk [vmem:[%s5027_s20 + $0x20] sm:$0xf] %vm3065_vm3, %v3041_v34  ;;  %v2880_v22 = vadd.f32 %v5017_v33, %v2879_v26  ;;  %v2298_v50 = vpop.f32.mrf.mxu3 }
 0x2b7   : > { %v2661_v62 = vpop.f32.mrf.mxu2 }
 0x2b8   : > { %v2978_v13 = vadd.f32 %v2946_v57, %v2880_v22  ;;  %v2701_v25 = vadd.f32 %v2661_v62, %v2402_v23  ;;  %v522_v23 = vld [vmem:[%s3851_s26 + $0x38] sm:$0xff]  }
 0x2ba   : > { %v3010_v41 = vmax.f32 %v2978_v13, 0.0  ;;  %v2737_v42 = vadd.f32 %v4927_v51, %v2701_v25  ;;  %v2404_v6 = vpop.f32.mrf.mxu1  ;;  %v2951_v25 = vunpack.c.l.bf16 %v522_v23 }
 0x2bb   : > { %v2405_v14 = vadd.f32 %v2404_v6, %v2291_v39 }
 0x2bc   : > { %v3042_v47 = vpack.c.bf16 %v3010_v41, %v3010_v41  ;;  %v2769_v38 = vmax.f32 %v2737_v42, 0.0 }
 0x2bd   : > { %v2882_v0 = vpop.f32.mrf.mxu0 }
 0x2be   : > { %3075 = vst.msk [vmem:[%s5027_s20 + $0x24] sm:$0xf] %vm3065_vm3, %v3042_v47  ;;  %v2787_v31 = vpack.c.bf16 %v2769_v38, %v2768_v55  ;;  %v2883_v9 = vadd.f32 %v5017_v33, %v2882_v0  ;;  %v2952_v38 = vunpack.c.h.bf16 %v522_v23 }
 0x2bf   : > { %v2664_v19 = vpop.f32.mrf.mxu2 }
 0x2c0   : > { %v2979_v46 = vadd.f32 %v2947_v11, %v2883_v9  ;;  %3592 = vmatmul.msk.bf16.gmra.mxu0 %vm2795_vm1, %v2787_v31  ;;  %v2702_v32 = vadd.f32 %v2664_v19, %v2405_v14  ;;  %v524_v31 = vld [vmem:[%s3851_s26 + $0x40] sm:$0xff]  }
 0x2c2   : > { %v3011_v53 = vmax.f32 %v2979_v46, 0.0  ;;  %v2406_v21 = vpop.f32.mrf.mxu1  ;;  %v2738_v4 = vadd.f32 %v4927_v51, %v2702_v32  ;;  %v2953_v46 = vunpack.c.l.bf16 %v524_v31  ;;  %v2954_v32 = vunpack.c.h.bf16 %v524_v31 }
 0x2c3   : > { %v2407_v2 = vadd.f32 %v2406_v21, %v2293_v54 }
 0x2c4   : > { %v3043_v52 = vpack.c.bf16 %v3011_v53, %v3011_v53  ;;  %v2770_v36 = vmax.f32 %v2738_v4, 0.0 }
 0x2c5   : > { %v2884_v58 = vpop.f32.mrf.mxu0 }
 0x2c6   : > { %3076 = vst.msk [vmem:[%s5027_s20 + $0x28] sm:$0xf] %vm3065_vm3, %v3043_v52  ;;  %v2885_v56 = vadd.f32 %v5017_v33, %v2884_v58 }
 0x2c7   : > { %v2666_v16 = vpop.f32.mrf.mxu2 }
 0x2c8   : > { %v2980_v20 = vadd.f32 %v2948_v37, %v2885_v56  ;;  %v2703_v1 = vadd.f32 %v2666_v16, %v2407_v2  ;;  %v526_v56 = vld [vmem:[%s3851_s26 + $0x48] sm:$0xff]  }
 0x2ca   : > { %v3012_v43 = vmax.f32 %v2980_v20, 0.0  ;;  %v2739_v60 = vadd.f32 %v4927_v51, %v2703_v1  ;;  %v2409_v28 = vpop.f32.mrf.mxu1  ;;  %v2955_v20 = vunpack.c.l.bf16 %v526_v56 }
 0x2cb   : > { %v2410_v24 = vadd.f32 %v2409_v28, %v2296_v61  ;;  %v2956_v28 = vunpack.c.h.bf16 %v526_v56 }
 0x2cc   : > { %v3044_v49 = vpack.c.bf16 %v3012_v43, %v3012_v43  ;;  %v2771_v45 = vmax.f32 %v2739_v60, 0.0 }
 0x2cd   : > { %v2887_v17 = vpop.f32.mrf.mxu0 }
 0x2ce   : > { %3077 = vst.msk [vmem:[%s5027_s20 + $0x2c] sm:$0xf] %vm3065_vm3, %v3044_v49  ;;  %v2788_v30 = vpack.c.bf16 %v2771_v45, %v2770_v36  ;;  %v2888_v48 = vadd.f32 %v5017_v33, %v2887_v17 }
 0x2cf   : > { %v2669_v29 = vpop.f32.mrf.mxu2 }
 0x2d0   : > { %v2981_v12 = vadd.f32 %v2949_v63, %v2888_v48  ;;  %3593 = vmatmul.msk.bf16.gmra.mxu0 %vm2795_vm1, %v2788_v30  ;;  %v2704_v5 = vadd.f32 %v2669_v29, %v2410_v24  ;;  %v528_v63 = vld [vmem:[%s3851_s26 + $0x50] sm:$0xff]  }
 0x2d1   : > { %v2957_v48 = vunpack.c.l.bf16 %v528_v63 }
 0x2d2   : > { %v3013_v18 = vmax.f32 %v2981_v12, 0.0  ;;  %v2411_v10 = vpop.f32.mrf.mxu1  ;;  %v2740_v40 = vadd.f32 %v4927_v51, %v2704_v5 }
 0x2d3   : > { %v2412_v15 = vadd.f32 %v2411_v10, %v2298_v50 }
 0x2d4   : > { %v3045_v59 = vpack.c.bf16 %v3013_v18, %v3013_v18  ;;  %v2772_v62 = vmax.f32 %v2740_v40, 0.0 }
 0x2d5   : > { %v2889_v7 = vpop.f32.mrf.mxu0 }
 0x2d6   : > { %3078 = vst.msk [vmem:[%s5027_s20 + $0x30] sm:$0xf] %vm3065_vm3, %v3045_v59  ;;  %v2890_v8 = vadd.f32 %v5017_v33, %v2889_v7  ;;  %v2958_v59 = vunpack.c.h.bf16 %v528_v63  ;;  %v530_v7 = vld [vmem:[%s3851_s26 + $0x58] sm:$0xff]  }
 0x2d7   : > { %v2671_v34 = vpop.f32.mrf.mxu2 }
 0x2d8   : > { %v2982_v57 = vadd.f32 %v2950_v44, %v2890_v8  ;;  %v2705_v26 = vadd.f32 %v2671_v34, %v2412_v15  ;;  %v2959_v34 = vunpack.c.l.bf16 %v530_v7 }
 0x2da   : > { %v3014_v22 = vmax.f32 %v2982_v57, 0.0  ;;  %v2741_v39 = vadd.f32 %v4927_v51, %v2705_v26 }
 0x2dc   : > { %v3046_v3 = vpack.c.bf16 %v3014_v22, %v3014_v22  ;;  %v2773_v13 = vmax.f32 %v2741_v39, 0.0  ;;  %v2960_v39 = vunpack.c.h.bf16 %v530_v7 }
 0x2dd   : > { %v2892_v35 = vpop.f32.mrf.mxu0 }
 0x2de   : > { %3079 = vst.msk [vmem:[%s5027_s20 + $0x34] sm:$0xf] %vm3065_vm3, %v3046_v3  ;;  %v2789_v41 = vpack.c.bf16 %v2773_v13, %v2772_v62  ;;  %v2893_v42 = vadd.f32 %v5017_v33, %v2892_v35 }
 0x2e0   : > { %v2983_v6 = vadd.f32 %v2951_v25, %v2893_v42  ;;  %3594 = vmatmul.msk.bf16.gmra.mxu0 %vm2795_vm1, %v2789_v41  ;;  %v532_v25 = vld [vmem:[%s3851_s26 + $0x60] sm:$0xff]  }
 0x2e1   : > { %v2961_v42 = vunpack.c.l.bf16 %v532_v25 }
 0x2e2   : > { %v3015_v55 = vmax.f32 %v2983_v6, 0.0 }
 0x2e4   : > { %v3047_v47 = vpack.c.bf16 %v3015_v55, %v3015_v55 }
 0x2e5   : > { %v2894_v11 = vpop.f32.mrf.mxu0 }
 0x2e6   : > { %3080 = vst.msk [vmem:[%s5027_s20 + $0x38] sm:$0xf] %vm3065_vm3, %v3047_v47  ;;  %v2895_v51 = vadd.f32 %v5017_v33, %v2894_v11 }
 0x2e8   : > { %v2984_v0 = vadd.f32 %v2952_v38, %v2895_v51  ;;  %v2962_v51 = vunpack.c.h.bf16 %v532_v25 }
 0x2ea   : > { %v3016_v9 = vmax.f32 %v2984_v0, 0.0 }
 0x2ec   : > { %v3048_v19 = vpack.c.bf16 %v3016_v9, %v3016_v9 }
 0x2ed   : > { %v2897_v54 = vpop.f32.mrf.mxu0 }
 0x2ee   : > { %3081 = vst.msk [vmem:[%s5027_s20 + $0x3c] sm:$0xf] %vm3065_vm3, %v3048_v19  ;;  %v2898_v14 = vadd.f32 %v5017_v33, %v2897_v54  ;;  %v534_v19 = vld [vmem:[%s3851_s26 + $0x68] sm:$0xff]  }
 0x2f0   : > { %v2985_v53 = vadd.f32 %v2953_v46, %v2898_v14  ;;  %v2963_v14 = vunpack.c.l.bf16 %v534_v19 }
 0x2f2   : > { %v3017_v21 = vmax.f32 %v2985_v53, 0.0 }
 0x2f4   : > { %v3049_v52 = vpack.c.bf16 %v3017_v21, %v3017_v21 }
 0x2f5   : > { %v2899_v37 = vpop.f32.mrf.mxu0 }
 0x2f6   : > { %3082 = vst.msk [vmem:[%s5027_s20 + $0x40] sm:$0xf] %vm3065_vm3, %v3049_v52  ;;  %v2900_v58 = vadd.f32 %v5017_v33, %v2899_v37 }
 0x2f8   : > { %v2986_v2 = vadd.f32 %v2954_v32, %v2900_v58  ;;  %v2964_v58 = vunpack.c.h.bf16 %v534_v19 }
 0x2fa   : > { %v3018_v16 = vmax.f32 %v2986_v2, 0.0 }
 0x2fc   : > { %v3050_v4 = vpack.c.bf16 %v3018_v16, %v3018_v16 }
 0x2fd   : > { %v2902_v1 = vpop.f32.mrf.mxu0 }
 0x2fe   : > { %3083 = vst.msk [vmem:[%s5027_s20 + $0x44] sm:$0xf] %vm3065_vm3, %v3050_v4  ;;  %v2903_v27 = vadd.f32 %v5017_v33, %v2902_v1  ;;  %v536_v4 = vld [vmem:[%s3851_s26 + $0x70] sm:$0xff]  }
 0x300   : > { %v2987_v43 = vadd.f32 %v2955_v20, %v2903_v27  ;;  %v2965_v27 = vunpack.c.l.bf16 %v536_v4 }
 0x302   : > { %v3019_v60 = vmax.f32 %v2987_v43, 0.0 }
 0x304   : > { %v3051_v61 = vpack.c.bf16 %v3019_v60, %v3019_v60 }
 0x305   : > { %v2904_v36 = vpop.f32.mrf.mxu0 }
 0x306   : > { %3084 = vst.msk [vmem:[%s5027_s20 + $0x48] sm:$0xf] %vm3065_vm3, %v3051_v61  ;;  %v2905_v49 = vadd.f32 %v5017_v33, %v2904_v36 }
 0x308   : > { %v2988_v45 = vadd.f32 %v2956_v28, %v2905_v49  ;;  %v2966_v49 = vunpack.c.h.bf16 %v536_v4 }
 0x30a   : > { %v3020_v17 = vmax.f32 %v2988_v45, 0.0 }
 0x30c   : > { %v3052_v30 = vpack.c.bf16 %v3020_v17, %v3020_v17 }
 0x30d   : > { %v2907_v29 = vpop.f32.mrf.mxu0 }
 0x30e   : > { %3085 = vst.msk [vmem:[%s5027_s20 + $0x4c] sm:$0xf] %vm3065_vm3, %v3052_v30  ;;  %v2908_v12 = vadd.f32 %v5017_v33, %v2907_v29  ;;  %v538_v30 = vld [vmem:[%s3851_s26 + $0x78] sm:$0xff]  }
 0x310   : > { %v2989_v24 = vadd.f32 %v2957_v48, %v2908_v12  ;;  %v2967_v12 = vunpack.c.l.bf16 %v538_v30 }
 0x312   : > { %v3021_v18 = vmax.f32 %v2989_v24, 0.0 }
 0x314   : > { %v3053_v10 = vpack.c.bf16 %v3021_v18, %v3021_v18 }
 0x315   : > { %v2909_v5 = vpop.f32.mrf.mxu0 }
 0x316   : > { %3086 = vst.msk [vmem:[%s5027_s20 + $0x50] sm:$0xf] %vm3065_vm3, %v3053_v10  ;;  %v2910_v44 = vadd.f32 %v5017_v33, %v2909_v5 }
 0x318   : > { %v2990_v50 = vadd.f32 %v2958_v59, %v2910_v44  ;;  %v2968_v44 = vunpack.c.h.bf16 %v538_v30 }
 0x31a   : > { %v3022_v15 = vmax.f32 %v2990_v50, 0.0 }
 0x31c   : > { %v3054_v8 = vpack.c.bf16 %v3022_v15, %v3022_v15 }
 0x31d   : > { %v2912_v40 = vpop.f32.mrf.mxu0 }
 0x31e   : > { %3087 = vst.msk [vmem:[%s5027_s20 + $0x54] sm:$0xf] %vm3065_vm3, %v3054_v8  ;;  %v2913_v57 = vadd.f32 %v5017_v33, %v2912_v40 }
 0x320   : > { %v2991_v26 = vadd.f32 %v2959_v34, %v2913_v57 }
 0x322   : > { %v3023_v23 = vmax.f32 %v2991_v26, 0.0 }
 0x324   : > { %v3055_v22 = vpack.c.bf16 %v3023_v23, %v3023_v23 }
 0x325   : > { %v2914_v62 = vpop.f32.mrf.mxu0 }
 0x326   : > { %3088 = vst.msk [vmem:[%s5027_s20 + $0x58] sm:$0xf] %vm3065_vm3, %v3055_v22  ;;  %v2915_v3 = vadd.f32 %v5017_v33, %v2914_v62 }
 0x328   : > { %v2992_v13 = vadd.f32 %v2960_v39, %v2915_v3 }
 0x32a   : > { %v3024_v35 = vmax.f32 %v2992_v13, 0.0 }
 0x32c   : > { %v3056_v41 = vpack.c.bf16 %v3024_v35, %v3024_v35 }
 0x32d   : > { %v2917_v6 = vpop.f32.mrf.mxu0 }
 0x32e   : > { %3089 = vst.msk [vmem:[%s5027_s20 + $0x5c] sm:$0xf] %vm3065_vm3, %v3056_v41  ;;  %v2918_v55 = vadd.f32 %v5017_v33, %v2917_v6 }
 0x330   : > { %v2993_v47 = vadd.f32 %v2961_v42, %v2918_v55 }
 0x332   : > { %v3025_v38 = vmax.f32 %v2993_v47, 0.0 }
 0x334   : > { %v3057_v11 = vpack.c.bf16 %v3025_v38, %v3025_v38 }
 0x335   : > { %v2919_v0 = vpop.f32.mrf.mxu0 }
 0x336   : > { %3090 = vst.msk [vmem:[%s5027_s20 + $0x60] sm:$0xf] %vm3065_vm3, %v3057_v11  ;;  %v2920_v31 = vadd.f32 %v5017_v33, %v2919_v0 }
 0x338   : > { %v2994_v9 = vadd.f32 %v2962_v51, %v2920_v31 }
 0x33a   : > { %v3026_v46 = vmax.f32 %v2994_v9, 0.0 }
 0x33c   : > { %v3058_v54 = vpack.c.bf16 %v3026_v46, %v3026_v46 }
 0x33d   : > { %v2922_v53 = vpop.f32.mrf.mxu0 }
 0x33e   : > { %3091 = vst.msk [vmem:[%s5027_s20 + $0x64] sm:$0xf] %vm3065_vm3, %v3058_v54  ;;  %v2923_v21 = vadd.f32 %v5017_v33, %v2922_v53 }
 0x340   : > { %v2995_v52 = vadd.f32 %v2963_v14, %v2923_v21 }
 0x342   : > { %v3027_v32 = vmax.f32 %v2995_v52, 0.0 }
 0x344   : > { %v3059_v37 = vpack.c.bf16 %v3027_v32, %v3027_v32 }
 0x345   : > { %v2924_v2 = vpop.f32.mrf.mxu0 }
 0x346   : > { %3092 = vst.msk [vmem:[%s5027_s20 + $0x68] sm:$0xf] %vm3065_vm3, %v3059_v37  ;;  %v2925_v56 = vadd.f32 %v5017_v33, %v2924_v2 }
 0x348   : > { %v2996_v16 = vadd.f32 %v2964_v58, %v2925_v56 }
 0x34a   : > { %v3028_v20 = vmax.f32 %v2996_v16, 0.0 }
 0x34c   : > { %v3060_v1 = vpack.c.bf16 %v3028_v20, %v3028_v20 }
 0x34d   : > { %v2927_v43 = vpop.f32.mrf.mxu0 }
 0x34e   : > { %3093 = vst.msk [vmem:[%s5027_s20 + $0x6c] sm:$0xf] %vm3065_vm3, %v3060_v1  ;;  %v2928_v60 = vadd.f32 %v5017_v33, %v2927_v43 }
 0x350   : > { %v2997_v61 = vadd.f32 %v2965_v27, %v2928_v60 }
 0x352   : > { %v3029_v28 = vmax.f32 %v2997_v61, 0.0 }
 0x354   : > { %v3061_v36 = vpack.c.bf16 %v3029_v28, %v3029_v28 }
 0x355   : > { %v2929_v45 = vpop.f32.mrf.mxu0 }
 0x356   : > { %3094 = vst.msk [vmem:[%s5027_s20 + $0x70] sm:$0xf] %vm3065_vm3, %v3061_v36  ;;  %v2930_v63 = vadd.f32 %v5017_v33, %v2929_v45 }
 0x358   : > { %v2998_v17 = vadd.f32 %v2966_v49, %v2930_v63 }
 0x35a   : > { %v3030_v48 = vmax.f32 %v2998_v17, 0.0 }
 0x35c   : > { %v3062_v29 = vpack.c.bf16 %v3030_v48, %v3030_v48 }
 0x35d   : > { %v2932_v24 = vpop.f32.mrf.mxu0 }
 0x35e   : > { %3095 = vst.msk [vmem:[%s5027_s20 + $0x74] sm:$0xf] %vm3065_vm3, %v3062_v29  ;;  %v2933_v18 = vadd.f32 %v5017_v33, %v2932_v24 }
 0x360   : > { %v2999_v10 = vadd.f32 %v2967_v12, %v2933_v18 }
 0x362   : > { %v3031_v59 = vmax.f32 %v2999_v10, 0.0 }
 0x364   : > { %v3063_v5 = vpack.c.bf16 %v3031_v59, %v3031_v59 }
 0x365   : > { %v2934_v50 = vpop.f32.mrf.mxu0 }
 0x366   : > { %3096 = vst.msk [vmem:[%s5027_s20 + $0x78] sm:$0xf] %vm3065_vm3, %v3063_v5  ;;  %v2935_v7 = vadd.f32 %v5017_v33, %v2934_v50 }
 0x368   : > { %v3000_v15 = vadd.f32 %v2968_v44, %v2935_v7 }
 0x36a   : > { %v3032_v8 = vmax.f32 %v3000_v15, 0.0 }
 0x36c   : > { %v3064_v34 = vpack.c.bf16 %v3032_v8, %v3032_v8 }
 0x36e   : > { %3097 = vst.msk [vmem:[%s5027_s20 + $0x7c] sm:$0xf] %vm3065_vm3, %v3064_v34 }
 0x36f PF: > { %s19_s13 = sadd.s32 1, %s3746_s13   ;;  %s5207_s30 = smov %s3738_s11 }
 0x370   : > { %p16_p12 = scmp.ge.s32.totalorder %s19_s13, 6   ;;  %s5208_s10 = smov %s3742_s12 }
 0x371   : > { %s5209_s11 = smov %s5212_s14  ;;  %s5210_s12 = smov %s5216_s15 }
 0x372   :  { %18 = sbr.rel (!%p16_p12) target bundleno = 3 (0x3), region = 94 }

</bundles_post_ra>
